<compile_context>
chip_gen: v7x
topology: tpu7x:2x2x1
jax: 0.10.0
libtpu: 0.0.40
codegen_flags: <defaults>
</compile_context>

<pallas_src>
import functools

import jax
import jax.numpy as jnp
from jax.experimental import pallas as pl
from jax.experimental.pallas import tpu as pltpu

LN_EPS = 1e-5


def _round_up(n: int, m: int) -> int:
    return ((n + m - 1) // m) * m


def _res_ffn_kernel(x_ref, w1_ref, b1_ref, w2_ref, b2_ref, g_ref, beta_ref, o_ref):
    # x_ref: (rt, C) row tile; weights/biases are fully resident, single-buffered.
    x = x_ref[...]
    x_f32 = x.astype(jnp.float32)

    # Linear 1 + ReLU.  MXU consumes the weight dtype (bf16 when cast in the wrapper),
    # accumulates in f32; bias + ReLU on the VPU in f32.
    h = jnp.dot(x.astype(w1_ref.dtype), w1_ref[...],
                preferred_element_type=jnp.float32)
    h = jnp.maximum(h + b1_ref[...].astype(jnp.float32), 0.0)

    # Linear 2 + bias + residual, all f32 accumulation.
    y = jnp.dot(h.astype(w2_ref.dtype), w2_ref[...],
                preferred_element_type=jnp.float32)
    y = y + b2_ref[...].astype(jnp.float32) + x_f32

    # LayerNorm over the feature (lane) dim.  One-pass statistics: the two XLU
    # reductions (mean, mean of squares) are independent instead of serial.
    mean = jnp.mean(y, axis=-1, keepdims=True)
    mean_sq = jnp.mean(y * y, axis=-1, keepdims=True)
    var = jnp.maximum(mean_sq - mean * mean, 0.0)
    inv = jax.lax.rsqrt(var + LN_EPS)
    out = (y - mean) * inv * g_ref[...].astype(jnp.float32) + beta_ref[...].astype(jnp.float32)

    o_ref[...] = out.astype(o_ref.dtype)


@functools.partial(
    jax.jit,
    static_argnames=("row_tile", "cast_matmul_to_bf16", "input_buffers", "vmem_cap_bytes"),
)
def res_feed_forward_block(x, w1, b1, w2, b2, gamma, beta, *,
                           row_tile=512, cast_matmul_to_bf16=True,
                           input_buffers=2, vmem_cap_bytes=48 * 1024 * 1024):
    """x: [..., C];  w1: [C, H]; b1: [H]; w2: [H, C]; b2: [C]; gamma/beta: [C]."""
    orig_shape = x.shape
    C = orig_shape[-1]
    H = w1.shape[1]
    # TODO(synk): if C is not a multiple of 128, pad the feature dim once at
    # parameter-layout time (and mask the LN reduction) to keep the output lane-dense.

    # Cast f32 weights to bf16 once in HBM (halves the resident DMA and runs the MXU
    # at bf16 throughput).  Opt out with cast_matmul_to_bf16=False for exact f32 math.
    if cast_matmul_to_bf16 and w1.dtype == jnp.float32:
        w1 = w1.astype(jnp.bfloat16)
    if cast_matmul_to_bf16 and w2.dtype == jnp.float32:
        w2 = w2.astype(jnp.bfloat16)

    x2d = x.reshape(-1, C)
    rows = x2d.shape[0]

    # Row tile: as large as requested, clamped for small inputs, rounded up to the
    # sublane packing granularity of the input dtype.
    gran = {4: 8, 2: 16, 1: 32}.get(jnp.dtype(x.dtype).itemsize, 8)
    rt = min(row_tile, _round_up(rows, gran))
    rt = max(gran, _round_up(rt, gran))

    # No HBM pad/slice round trip: ragged last tile is handled by Pallas (OOB output
    # rows are masked on writeback; garbage input rows only affect those masked rows).
    grid = (pl.cdiv(rows, rt),)

    # 2D (1, K) views so the lane axis carries the feature dim.
    b1_2d = b1.reshape(1, H)
    b2_2d = b2.reshape(1, C)
    g_2d = gamma.reshape(1, C)
    beta_2d = beta.reshape(1, C)

    # VMEM budget from the actual footprint: resident weights (single-buffered) +
    # pipelined x / out tiles + slack for Mosaic internal scratch.  Capped so a v7x
    # TensorCore (64 MiB physical VMEM) keeps headroom; raise the cap on v5e/v6e.
    isz = lambda a: jnp.dtype(a.dtype).itemsize
    resident = (C * H * isz(w1) + H * C * isz(w2)
                + 8 * H * isz(b1) + 8 * C * (isz(b2) + isz(gamma) + isz(beta)))
    io = (input_buffers + 2) * rt * C * isz(x)
    vmem_limit = int(min(vmem_cap_bytes, resident + io + (16 << 20)))

    full = lambda i: (0, 0)
    single = pl.Buffered(1)  # constant index map -> one resident copy, no double buffer

    out = pl.pallas_call(
        _res_ffn_kernel,
        out_shape=jax.ShapeDtypeStruct((rows, C), x.dtype),
        grid_spec=pltpu.PrefetchScalarGridSpec(
            num_scalar_prefetch=0,
            grid=grid,
            in_specs=[
                pl.BlockSpec((rt, C), lambda i: (i, 0),
                             pipeline_mode=pl.Buffered(input_buffers)),   # x row tile
                pl.BlockSpec((C, H), full, pipeline_mode=single),          # w1 (resident)
                pl.BlockSpec((1, H), full, pipeline_mode=single),          # b1
                pl.BlockSpec((H, C), full, pipeline_mode=single),          # w2 (resident)
                pl.BlockSpec((1, C), full, pipeline_mode=single),          # b2
                pl.BlockSpec((1, C), full, pipeline_mode=single),          # gamma
                pl.BlockSpec((1, C), full, pipeline_mode=single),          # beta
            ],
            out_specs=pl.BlockSpec((rt, C), lambda i: (i, 0)),
        ),
        compiler_params=pltpu.CompilerParams(
            dimension_semantics=("parallel",),   # row tiles shard across TCs (v7x megacore)
            vmem_limit_bytes=vmem_limit,
        ),
    )(x2d, w1, b1_2d, w2, b2_2d, g_2d, beta_2d)

    return out.reshape(orig_shape)


def _reference(x, w1, b1, w2, b2, gamma, beta, matmul_dtype=jnp.float32):
    """Pure-JAX reference; matmul_dtype mirrors the kernel's MXU operand dtype."""
    xf = x.astype(jnp.float32)
    h = jnp.dot(xf.astype(matmul_dtype), w1.astype(matmul_dtype),
                preferred_element_type=jnp.float32)
    h = jnp.maximum(h + b1.astype(jnp.float32), 0.0)
    y = jnp.dot(h.astype(matmul_dtype), w2.astype(matmul_dtype),
                preferred_element_type=jnp.float32)
    y = y + b2.astype(jnp.float32) + xf
    mean = jnp.mean(y, axis=-1, keepdims=True)
    var = jnp.mean((y - mean) ** 2, axis=-1, keepdims=True)
    return ((y - mean) * jax.lax.rsqrt(var + LN_EPS)) * gamma + beta


if __name__ == "__main__":
    # Shapes implied by the module: Linear(in_channels -> hidden_channels -> in_channels),
    # LayerNorm(in_channels). Input: [batch, seq, in_channels]. rows = 384.
    batch, seq, in_channels, hidden_channels = 4, 96, 128, 256

    key = jax.random.PRNGKey(0)
    kx, k1, k2, k3, k4 = jax.random.split(key, 5)

    x = jax.random.normal(kx, (batch, seq, in_channels), dtype=jnp.float32)

    # Deterministic parameter init (uniform, PyTorch-Linear-like bounds).
    bound1 = 1.0 / (in_channels ** 0.5)
    bound2 = 1.0 / (hidden_channels ** 0.5)
    w1 = jax.random.uniform(k1, (in_channels, hidden_channels), jnp.float32, -bound1, bound1)
    b1 = jax.random.uniform(k2, (hidden_channels,), jnp.float32, -bound1, bound1)
    w2 = jax.random.uniform(k3, (hidden_channels, in_channels), jnp.float32, -bound2, bound2)
    b2 = jax.random.uniform(k4, (in_channels,), jnp.float32, -bound2, bound2)
    gamma = jnp.ones((in_channels,), jnp.float32)   # LayerNorm default affine init
    beta = jnp.zeros((in_channels,), jnp.float32)

    ref_f32 = _reference(x, w1, b1, w2, b2, gamma, beta, jnp.float32)
    ref_bf16 = _reference(x, w1, b1, w2, b2, gamma, beta, jnp.bfloat16)

    # 1) exact f32 matmul path (single block: rt clamps to rows=384).
    out_f32 = jax.block_until_ready(
        res_feed_forward_block(x, w1, b1, w2, b2, gamma, beta, cast_matmul_to_bf16=False))
    assert out_f32.shape == x.shape
    err = float(jnp.max(jnp.abs(out_f32 - ref_f32)))
    assert jnp.allclose(out_f32, ref_f32, atol=1e-3, rtol=1e-3), f"f32 path mismatch ({err})"

    # 2) default bf16-matmul path, checked against the matching bf16 reference
    #    (and loosely against the pure-f32 reference as a sanity check).
    out_bf16 = jax.block_until_ready(
        res_feed_forward_block(x, w1, b1, w2, b2, gamma, beta))
    err = float(jnp.max(jnp.abs(out_bf16 - ref_bf16)))
    assert jnp.allclose(out_bf16, ref_bf16, atol=2e-3, rtol=2e-3), f"bf16 path mismatch ({err})"
    assert jnp.allclose(out_bf16, ref_f32, atol=5e-2, rtol=5e-2), "bf16 path drifted from f32 ref"

    # 3) ragged last tile: rows=384 with row_tile=256 -> 2 grid steps, last block partial.
    out_ragged = jax.block_until_ready(
        res_feed_forward_block(x, w1, b1, w2, b2, gamma, beta, row_tile=256))
    err = float(jnp.max(jnp.abs(out_ragged - ref_bf16)))
    assert jnp.allclose(out_ragged, ref_bf16, atol=2e-3, rtol=2e-3), f"ragged path mismatch ({err})"

    print("KERNEL_OK")
</pallas_src>

<mosaic_0001>
module attributes {stable_mosaic.version = 11 : i64} {
  func.func @_res_ffn_kernel(%arg0: i32, %arg1: memref<384x128xf32, #tpu.memory_space<vmem>>, %arg2: memref<128x256xf32, #tpu.memory_space<vmem>>, %arg3: memref<1x256xf32, #tpu.memory_space<vmem>>, %arg4: memref<256x128xf32, #tpu.memory_space<vmem>>, %arg5: memref<1x128xf32, #tpu.memory_space<vmem>>, %arg6: memref<1x128xf32, #tpu.memory_space<vmem>>, %arg7: memref<1x128xf32, #tpu.memory_space<vmem>>, %arg8: memref<384x128xf32, #tpu.memory_space<vmem>>) attributes {dimension_semantics = [#tpu.dimension_semantics<parallel>], iteration_bounds = array<i64: 1>, scalar_prefetch = 0 : i64, scratch_operands = 0 : i64, tpu.core_type = #tpu.core_type<tc>, window_params = [{pipeline_mode = #tpu.pipeline_mode<double_buffered>, transform_indices = @transform_0, window_bounds = array<i64: 384, 128>}, {pipeline_mode = #tpu.pipeline_mode<synchronous>, transform_indices = @transform_1, window_bounds = array<i64: 128, 256>}, {pipeline_mode = #tpu.pipeline_mode<synchronous>, transform_indices = @transform_2, window_bounds = array<i64: 1, 256>}, {pipeline_mode = #tpu.pipeline_mode<synchronous>, transform_indices = @transform_3, window_bounds = array<i64: 256, 128>}, {pipeline_mode = #tpu.pipeline_mode<synchronous>, transform_indices = @transform_4, window_bounds = array<i64: 1, 128>}, {pipeline_mode = #tpu.pipeline_mode<synchronous>, transform_indices = @transform_5, window_bounds = array<i64: 1, 128>}, {pipeline_mode = #tpu.pipeline_mode<synchronous>, transform_indices = @transform_6, window_bounds = array<i64: 1, 128>}, {transform_indices = @transform_7, window_bounds = array<i64: 384, 128>}]} {
    %c0 = arith.constant 0 : index
    %c0_0 = arith.constant 0 : index
    %0 = vector.load %arg1[%c0, %c0_0] : memref<384x128xf32, #tpu.memory_space<vmem>>, vector<384x128xf32>
    %c0_1 = arith.constant 0 : index
    %c0_2 = arith.constant 0 : index
    %1 = vector.load %arg2[%c0_1, %c0_2] : memref<128x256xf32, #tpu.memory_space<vmem>>, vector<128x256xf32>
    %cst = arith.constant dense<0.000000e+00> : vector<384x256xf32>
    %2 = tpu.matmul %0, %1, %cst {dimension_numbers = #tpu.dot_dimension_numbers<[1], [0], [0], [1], [0, 0, 1, 1], [], []>} : vector<384x128xf32>, vector<128x256xf32>, vector<384x256xf32> -> vector<384x256xf32>
    %c0_3 = arith.constant 0 : index
    %c0_4 = arith.constant 0 : index
    %3 = vector.load %arg3[%c0_3, %c0_4] : memref<1x256xf32, #tpu.memory_space<vmem>>, vector<1x256xf32>
    %4 = vector.broadcast %3 : vector<1x256xf32> to vector<384x256xf32>
    %5 = arith.addf %2, %4 : vector<384x256xf32>
    %cst_5 = arith.constant 0.000000e+00 : f32
    %6 = vector.broadcast %cst_5 : f32 to vector<384x256xf32>
    %7 = arith.maximumf %5, %6 : vector<384x256xf32>
    %c0_6 = arith.constant 0 : index
    %c0_7 = arith.constant 0 : index
    %8 = vector.load %arg4[%c0_6, %c0_7] : memref<256x128xf32, #tpu.memory_space<vmem>>, vector<256x128xf32>
    %cst_8 = arith.constant dense<0.000000e+00> : vector<384x128xf32>
    %9 = tpu.matmul %7, %8, %cst_8 {dimension_numbers = #tpu.dot_dimension_numbers<[1], [0], [0], [1], [0, 0, 1, 1], [], []>} : vector<384x256xf32>, vector<256x128xf32>, vector<384x128xf32> -> vector<384x128xf32>
    %c0_9 = arith.constant 0 : index
    %c0_10 = arith.constant 0 : index
    %10 = vector.load %arg5[%c0_9, %c0_10] : memref<1x128xf32, #tpu.memory_space<vmem>>, vector<1x128xf32>
    %11 = vector.broadcast %10 : vector<1x128xf32> to vector<384x128xf32>
    %12 = arith.addf %9, %11 : vector<384x128xf32>
    %13 = arith.addf %12, %0 : vector<384x128xf32>
    %cst_11 = arith.constant dense<0.000000e+00> : vector<384xf32>
    %14 = vector.multi_reduction <add>, %13, %cst_11 [1] : vector<384x128xf32> to vector<384xf32>
    %15 = vector.shape_cast %14 : vector<384xf32> to vector<384x1xf32>
    %cst_12 = arith.constant 1.280000e+02 : f32
    %16 = vector.broadcast %cst_12 : f32 to vector<384x1xf32>
    %17 = arith.divf %15, %16 : vector<384x1xf32>
    %18 = arith.mulf %13, %13 : vector<384x128xf32>
    %cst_13 = arith.constant dense<0.000000e+00> : vector<384xf32>
    %19 = vector.multi_reduction <add>, %18, %cst_13 [1] : vector<384x128xf32> to vector<384xf32>
    %20 = vector.shape_cast %19 : vector<384xf32> to vector<384x1xf32>
    %cst_14 = arith.constant 1.280000e+02 : f32
    %21 = vector.broadcast %cst_14 : f32 to vector<384x1xf32>
    %22 = arith.divf %20, %21 : vector<384x1xf32>
    %23 = arith.mulf %17, %17 : vector<384x1xf32>
    %24 = arith.subf %22, %23 : vector<384x1xf32>
    %cst_15 = arith.constant 0.000000e+00 : f32
    %25 = vector.broadcast %cst_15 : f32 to vector<384x1xf32>
    %26 = arith.maximumf %24, %25 : vector<384x1xf32>
    %cst_16 = arith.constant 9.99999974E-6 : f32
    %27 = vector.broadcast %cst_16 : f32 to vector<384x1xf32>
    %28 = arith.addf %26, %27 : vector<384x1xf32>
    %29 = math.rsqrt %28 : vector<384x1xf32>
    %30 = vector.broadcast %17 : vector<384x1xf32> to vector<384x128xf32>
    %31 = arith.subf %13, %30 : vector<384x128xf32>
    %32 = vector.broadcast %29 : vector<384x1xf32> to vector<384x128xf32>
    %33 = arith.mulf %31, %32 : vector<384x128xf32>
    %c0_17 = arith.constant 0 : index
    %c0_18 = arith.constant 0 : index
    %34 = vector.load %arg6[%c0_17, %c0_18] : memref<1x128xf32, #tpu.memory_space<vmem>>, vector<1x128xf32>
    %35 = vector.broadcast %34 : vector<1x128xf32> to vector<384x128xf32>
    %36 = arith.mulf %33, %35 : vector<384x128xf32>
    %c0_19 = arith.constant 0 : index
    %c0_20 = arith.constant 0 : index
    %37 = vector.load %arg7[%c0_19, %c0_20] : memref<1x128xf32, #tpu.memory_space<vmem>>, vector<1x128xf32>
    %38 = vector.broadcast %37 : vector<1x128xf32> to vector<384x128xf32>
    %39 = arith.addf %36, %38 : vector<384x128xf32>
    %c0_21 = arith.constant 0 : index
    %c0_22 = arith.constant 0 : index
    %40 = vector.load %arg8[%c0_21, %c0_22] : memref<384x128xf32, #tpu.memory_space<vmem>>, vector<384x128xf32>
    tpu.vector_store %arg8[%c0_21, %c0_22], %39 {strides = array<i32>} : memref<384x128xf32, #tpu.memory_space<vmem>>, vector<384x128xf32>,
    return
  }
  func.func @transform_0(%arg0: i32) -> (i32, i32) {
    %c0_i32 = arith.constant 0 : i32
    %c0_i32_0 = arith.constant 0 : i32
    return %arg0, %c0_i32 : i32, i32
  }
  func.func @transform_1(%arg0: i32) -> (i32, i32) {
    %c0_i32 = arith.constant 0 : i32
    %c0_i32_0 = arith.constant 0 : i32
    %c0_i32_1 = arith.constant 0 : i32
    return %c0_i32, %c0_i32_0 : i32, i32
  }
  func.func @transform_2(%arg0: i32) -> (i32, i32) {
    %c0_i32 = arith.constant 0 : i32
    %c0_i32_0 = arith.constant 0 : i32
    %c0_i32_1 = arith.constant 0 : i32
    return %c0_i32, %c0_i32_0 : i32, i32
  }
  func.func @transform_3(%arg0: i32) -> (i32, i32) {
    %c0_i32 = arith.constant 0 : i32
    %c0_i32_0 = arith.constant 0 : i32
    %c0_i32_1 = arith.constant 0 : i32
    return %c0_i32, %c0_i32_0 : i32, i32
  }
  func.func @transform_4(%arg0: i32) -> (i32, i32) {
    %c0_i32 = arith.constant 0 : i32
    %c0_i32_0 = arith.constant 0 : i32
    %c0_i32_1 = arith.constant 0 : i32
    return %c0_i32, %c0_i32_0 : i32, i32
  }
  func.func @transform_5(%arg0: i32) -> (i32, i32) {
    %c0_i32 = arith.constant 0 : i32
    %c0_i32_0 = arith.constant 0 : i32
    %c0_i32_1 = arith.constant 0 : i32
    return %c0_i32, %c0_i32_0 : i32, i32
  }
  func.func @transform_6(%arg0: i32) -> (i32, i32) {
    %c0_i32 = arith.constant 0 : i32
    %c0_i32_0 = arith.constant 0 : i32
    %c0_i32_1 = arith.constant 0 : i32
    return %c0_i32, %c0_i32_0 : i32, i32
  }
  func.func @transform_7(%arg0: i32) -> (i32, i32) {
    %c0_i32 = arith.constant 0 : i32
    %c0_i32_0 = arith.constant 0 : i32
    return %arg0, %c0_i32 : i32, i32
  }
}

</mosaic_0001>

<bundles_post_ra>
// kernel: res_feed_forward_block.1
= control target key start
LH: loop header
LB: loop body
LE: loop exit
PB: predicated region body
PF: predicated region fallthrough
CT: control target
= control target key end

     0   :  { %12 = vsyncpa [#allocation3], 0  ;;  %s3192_s0 = inlined_call_operand.hbm [shape: f32[384,128], index: 0, kind: input, shape index: {}]   ;;  %s3193_s1 = inlined_call_operand.hbm [shape: f32[128,256], index: 1, kind: input, shape index: {}]   ;;  %s3194_s2 = inlined_call_operand.vmem [shape: f32[1,256], index: 2, kind: input, shape index: {}]   ;;  %s3195_s3 = inlined_call_operand.hbm [shape: f32[256,128], index: 3, kind: input, shape index: {}]   ;;  %s3196_s4 = inlined_call_operand.vmem [shape: f32[1,128], index: 4, kind: input, shape index: {}]   ;;  %s3197_s5 = inlined_call_operand.vmem [shape: f32[1,128], index: 5, kind: input, shape index: {}]   ;;  %s3198_s6 = inlined_call_operand.vmem [shape: f32[1,128], index: 6, kind: input, shape index: {}]   ;;  %s3199_s7 = inlined_call_operand.hbm [shape: f32[384,128], index: 7, kind: output, shape index: {}]  }
   0x1   :  { %13 = vsyncpa [#allocation6], 0 }
   0x2   :  { %14 = vsyncpa [#allocation4], 0  ;;  %s2215_s24 = smov [#allocation5]   ;;  %s2121_s28 = scalar_lea.hbm %s3193_s1, 4096 }
   0x3   :  { %s32_s25 = sshll.u32 %s2215_s24, 4  ;;  %p2122_p0 = scmp.ne.s32.totalorder %s3193_s1, %s2121_s28  ;;  %s33_s25 = int_to_ptr.vmem [resolvable:$true] %s32_s25 }
   0x4   :  { %p2125_p1 = scmp.lt.u32.totalorder %s2121_s28, %s3193_s1 }
   0x6   :  { %p2127_p2 = pnand %p2125_p1, %p2122_p0 }
   0x8   :  { %2130 = shalt.err (!%p2127_p2)
}
   0x9   :  { %s2131_s10 = scalar_lea.vmem %s33_s25, 4096  ;;  %p2136_p4 = scmp.lt.s32.totalorder %s33_s25, %s33_s25 }
   0xa   :  { %p2132_p3 = scmp.ne.s32.totalorder %s33_s25, %s2131_s10  ;;  %p2137_p5 = scmp.lt.s32.totalorder %s2131_s10, %s2131_s10 }
   0xc   :  { %p2138_p6 = por %p2137_p5, %p2136_p4 }
   0xe   :  { %p2139_p7 = pnand %p2138_p6, %p2132_p3 }
  0x10   :  { %2142 = shalt.err (!%p2139_p7)
}
  0x11   :  { %s2216_s11 = smov 256   ;;  %s2217_s12 = smov 16  }
  0x12   :  { %38 = dma.hbm_to_vmem [thread:$0]  %s3193_s1, 4096, %s33_s25, [#allocation6], %s2216_s11, %s2216_s11, %s2217_s12  }
  0x13   :  { %s2218_s15 = smov [#allocation2]   ;;  %s2143_s19 = scalar_lea.hbm %s3192_s0, 6144 }
  0x14   :  { %s20_s16 = sshll.u32 %s2218_s15, 4  ;;  %p2144_p8 = scmp.ne.s32.totalorder %s3192_s0, %s2143_s19  ;;  %s21_s16 = int_to_ptr.vmem [resolvable:$true] %s20_s16 }
  0x15   :  { %p2147_p9 = scmp.lt.u32.totalorder %s2143_s19, %s3192_s0 }
  0x17   :  { %p2149_p10 = pnand %p2147_p9, %p2144_p8 }
  0x19   :  { %2152 = shalt.err (!%p2149_p10)
}
  0x1a   :  { %s2153_s24 = scalar_lea.vmem %s21_s16, 6144  ;;  %p2158_p12 = scmp.lt.s32.totalorder %s21_s16, %s21_s16 }
  0x1b   :  { %p2154_p11 = scmp.ne.s32.totalorder %s21_s16, %s2153_s24  ;;  %p2159_p13 = scmp.lt.s32.totalorder %s2153_s24, %s2153_s24 }
  0x1d   :  { %p2160_p0 = por %p2159_p13, %p2158_p12 }
  0x1f   :  { %p2161_p1 = pnand %p2160_p0, %p2154_p11 }
  0x21   :  { %2164 = shalt.err (!%p2161_p1)
}
  0x22   :  { %s2219_s1 = smov 128   ;;  %s2220_s25 = smov 8  }
  0x23   :  { %26 = dma.hbm_to_vmem [thread:$0]  %s3192_s0, 6144, %s21_s16, [#allocation3], %s2219_s1, %s2219_s1, %s2220_s25  }
  0x24   :  { %s2221_s28 = smov [#allocation7]   ;;  %s2165_s9 = scalar_lea.hbm %s3195_s3, 4096 }
  0x25   :  { %s46_s29 = sshll.u32 %s2221_s28, 4  ;;  %p2166_p2 = scmp.ne.s32.totalorder %s3195_s3, %s2165_s9  ;;  %s47_s29 = int_to_ptr.vmem [resolvable:$true] %s46_s29 }
  0x26   :  { %p2169_p3 = scmp.lt.u32.totalorder %s2165_s9, %s3195_s3 }
  0x28   :  { %p2171_p4 = pnand %p2169_p3, %p2166_p2 }
  0x2a   :  { %2174 = shalt.err (!%p2171_p4)
}
  0x2b   :  { %s2175_s14 = scalar_lea.vmem %s47_s29, 4096  ;;  %p2180_p6 = scmp.lt.s32.totalorder %s47_s29, %s47_s29 }
  0x2c   :  { %p2176_p5 = scmp.ne.s32.totalorder %s47_s29, %s2175_s14  ;;  %p2181_p7 = scmp.lt.s32.totalorder %s2175_s14, %s2175_s14 }
  0x2e   :  { %p2182_p8 = por %p2181_p7, %p2180_p6 }
  0x30   :  { %p2183_p9 = pnand %p2182_p8, %p2176_p5 }
  0x32   :  { %2186 = shalt.err (!%p2183_p9)
}
  0x33   :  { %52 = dma.hbm_to_vmem [thread:$0]  %s3195_s3, 4096, %s47_s29, [#allocation6], %s2219_s1, %s2219_s1, %s2220_s25  }
  0x34   :  { %2209 = dma.done.wait [#allocation3], 6144  }
  0x35   :  { %2210 = vsyncadd [#allocation3], 4294961152 }
  0x36   :  { %2211 = dma.done.wait [#allocation6], 8192  }
  0x37   :  { %2212 = vsyncadd [#allocation6], 4294959104  ;;  %v2222_v0 = vmov 0.0   ;;  %v2223_v1 = vmov 0.0|0.0   ;;  %v117_v2 = vld [vmem:[#allocation5 + $0x8] sm:$0xff]  ;;  %v119_v3 = vld [vmem:[#allocation5 + $0x18] sm:$0xff] }
  0x38   :  { %224 = vmatprep.mubr.f32.mxu0 %v2222_v0  ;;  %1933 = vmatprep.subr.bf16.mxu1 %v2223_v1  ;;  %v116_v4 = vld [vmem:[#allocation5] sm:$0xff]  ;;  %v1853_v5 = vpack.c.bf16 %v119_v3, %v117_v2  ;;  %v118_v6 = vld [vmem:[#allocation5 + $0x10] sm:$0xff]  ;;  %v121_v7 = vld [vmem:[#allocation5 + $0x28] sm:$0xff] }
  0x39   :  { %v123_v8 = vld [vmem:[#allocation5 + $0x38] sm:$0xff]  ;;  %v1855_v9 = vpack.c.bf16 %v118_v6, %v116_v4  ;;  %v120_v11 = vld [vmem:[#allocation5 + $0x20] sm:$0xff]  ;;  %v122_v12 = vld [vmem:[#allocation5 + $0x30] sm:$0xff] }
  0x3a   :  { %v1857_v10 = vpack.c.bf16 %v123_v8, %v121_v7  ;;  %v125_v13 = vld [vmem:[#allocation5 + $0x48] sm:$0xff]  ;;  %1854 = vmatprep.subr.bf16.mxu0 %v1853_v5  ;;  %v127_v14 = vld [vmem:[#allocation5 + $0x58] sm:$0xff]  ;;  %v1859_v15 = vpack.c.bf16 %v122_v12, %v120_v11  ;;  %v124_v17 = vld [vmem:[#allocation5 + $0x40] sm:$0xff] }
  0x3b   :  { %1856 = vmatpush1.bf16.msra.mxu0 %v1855_v9  ;;  %v1861_v16 = vpack.c.bf16 %v127_v14, %v125_v13  ;;  %v126_v18 = vld [vmem:[#allocation5 + $0x50] sm:$0xff]  ;;  %v129_v19 = vld [vmem:[#allocation5 + $0x68] sm:$0xff]  ;;  %v131_v20 = vld [vmem:[#allocation5 + $0x78] sm:$0xff] }
  0x3c   :  { %1858 = vmatprep.subr.bf16.mxu0 %v1857_v10  ;;  %v1863_v21 = vpack.c.bf16 %v126_v18, %v124_v17  ;;  %v1865_v22 = vpack.c.bf16 %v131_v20, %v129_v19  ;;  %v128_v23 = vld [vmem:[#allocation5 + $0x60] sm:$0xff]  ;;  %v130_v24 = vld [vmem:[#allocation5 + $0x70] sm:$0xff]  ;;  %v133_v25 = vld [vmem:[#allocation5 + $0x88] sm:$0xff] }
  0x3d   :  { %v135_v26 = vld [vmem:[#allocation5 + $0x98] sm:$0xff]  ;;  %v1867_v27 = vpack.c.bf16 %v130_v24, %v128_v23  ;;  %v132_v28 = vld [vmem:[#allocation5 + $0x80] sm:$0xff]  ;;  %v134_v30 = vld [vmem:[#allocation5 + $0x90] sm:$0xff] }
  0x3e   :  { %v1869_v29 = vpack.c.bf16 %v135_v26, %v133_v25  ;;  %v609_v31 = vld [vmem:[#allocation7] sm:$0xff]  ;;  %v610_v32 = vld [vmem:[#allocation7 + $0x8] sm:$0xff]  ;;  %v139_v34 = vld [vmem:[#allocation5 + $0xb8] sm:$0xff]  ;;  %v1871_v38 = vpack.c.bf16 %v134_v30, %v132_v28 }
  0x3f   :  { %1860 = vmatpush1.bf16.msra.mxu0 %v1859_v15  ;;  %v137_v33 = vld [vmem:[#allocation5 + $0xa8] sm:$0xff]  ;;  %v1886_v35 = vpack.c.bf16 %v610_v32, %v609_v31  ;;  %v611_v36 = vld [vmem:[#allocation7 + $0x10] sm:$0xff]  ;;  %v612_v37 = vld [vmem:[#allocation7 + $0x18] sm:$0xff] }
  0x40   :  { %1862 = vmatprep.subr.bf16.mxu0 %v1861_v16  ;;  %v1873_v39 = vpack.c.bf16 %v139_v34, %v137_v33  ;;  %v136_v40 = vld [vmem:[#allocation5 + $0xa0] sm:$0xff]  ;;  %v138_v41 = vld [vmem:[#allocation5 + $0xb0] sm:$0xff]  ;;  %v141_v42 = vld [vmem:[#allocation5 + $0xc8] sm:$0xff]  ;;  %v1889_v44 = vpack.c.bf16 %v612_v37, %v611_v36 }
  0x41   :  { %1949 = vmatpush1.bf16.msra.mxu1 %v1886_v35  ;;  %v143_v43 = vld [vmem:[#allocation5 + $0xd8] sm:$0xff]  ;;  %v613_v45 = vld [vmem:[#allocation7 + $0x20] sm:$0xff]  ;;  %v614_v46 = vld [vmem:[#allocation7 + $0x28] sm:$0xff]  ;;  %v1875_v47 = vpack.c.bf16 %v138_v41, %v136_v40 }
  0x42   :  { %1934 = vmatprep.subr.bf16.mxu1 %v2223_v1  ;;  %v1877_v48 = vpack.c.bf16 %v143_v43, %v141_v42  ;;  %v140_v49 = vld [vmem:[#allocation5 + $0xc0] sm:$0xff]  ;;  %v142_v50 = vld [vmem:[#allocation5 + $0xd0] sm:$0xff]  ;;  %v145_v51 = vld [vmem:[#allocation5 + $0xe8] sm:$0xff]  ;;  %v1892_v53 = vpack.c.bf16 %v614_v46, %v613_v45 }
  0x43   :  { %1864 = vmatpush1.bf16.msra.mxu0 %v1863_v21  ;;  %v147_v52 = vld [vmem:[#allocation5 + $0xf8] sm:$0xff]  ;;  %v615_v54 = vld [vmem:[#allocation7 + $0x30] sm:$0xff]  ;;  %v1879_v56 = vpack.c.bf16 %v142_v50, %v140_v49  ;;  %v144_v58 = vld [vmem:[#allocation5 + $0xe0] sm:$0xff] }
  0x44   :  { %1866 = vmatprep.subr.bf16.mxu0 %v1865_v22  ;;  %v616_v55 = vld [vmem:[#allocation7 + $0x38] sm:$0xff]  ;;  %v1881_v57 = vpack.c.bf16 %v147_v52, %v145_v51  ;;  %v146_v59 = vld [vmem:[#allocation5 + $0xf0] sm:$0xff]  ;;  %v617_v61 = vld [vmem:[#allocation7 + $0x40] sm:$0xff] }
  0x45   :  { %1950 = vmatpush1.bf16.msra.mxu1 %v1889_v44  ;;  %v1895_v60 = vpack.c.bf16 %v616_v55, %v615_v54  ;;  %v618_v62 = vld [vmem:[#allocation7 + $0x48] sm:$0xff]  ;;  %v1883_v63 = vpack.c.bf16 %v146_v59, %v144_v58  ;;  %v68_v3 = vld [vmem:[#allocation2] sm:$0xff]  ;;  %v619_v4 = vld [vmem:[#allocation7 + $0x50] sm:$0xff] }
  0x46   :  { %1935 = vmatprep.subr.bf16.mxu1 %v2223_v1  ;;  %v1898_v2 = vpack.c.bf16 %v618_v62, %v617_v61  ;;  %v620_v5 = vld [vmem:[#allocation7 + $0x58] sm:$0xff]  ;;  %v69_v7 = vld [vmem:[#allocation2 + $0x8] sm:$0xff]  ;;  %v621_v8 = vld [vmem:[#allocation7 + $0x60] sm:$0xff] }
  0x47   :  { %1868 = vmatpush1.bf16.msra.mxu0 %v1867_v27  ;;  %v1901_v6 = vpack.c.bf16 %v620_v5, %v619_v4  ;;  %v622_v9 = vld [vmem:[#allocation7 + $0x68] sm:$0xff]  ;;  %v70_v11 = vld [vmem:[#allocation2 + $0x10] sm:$0xff]  ;;  %v624_v13 = vld [vmem:[#allocation7 + $0x78] sm:$0xff] }
  0x48   :  { %1870 = vmatprep.subr.bf16.mxu0 %v1869_v29  ;;  %v1904_v10 = vpack.c.bf16 %v622_v9, %v621_v8  ;;  %v623_v12 = vld [vmem:[#allocation7 + $0x70] sm:$0xff]  ;;  %v71_v15 = vld [vmem:[#allocation2 + $0x18] sm:$0xff]  ;;  %v625_v16 = vld [vmem:[#allocation7 + $0x80] sm:$0xff] }
  0x49   :  { %1951 = vmatpush1.bf16.msra.mxu1 %v1892_v53  ;;  %v1907_v14 = vpack.c.bf16 %v624_v13, %v623_v12  ;;  %v626_v17 = vld [vmem:[#allocation7 + $0x88] sm:$0xff]  ;;  %v72_v19 = vld [vmem:[#allocation2 + $0x20] sm:$0xff]  ;;  %v627_v20 = vld [vmem:[#allocation7 + $0x90] sm:$0xff] }
  0x4a   :  { %1936 = vmatprep.subr.bf16.mxu1 %v2223_v1  ;;  %v1910_v18 = vpack.c.bf16 %v626_v17, %v625_v16  ;;  %v628_v21 = vld [vmem:[#allocation7 + $0x98] sm:$0xff]  ;;  %v73_v23 = vld [vmem:[#allocation2 + $0x28] sm:$0xff]  ;;  %v629_v24 = vld [vmem:[#allocation7 + $0xa0] sm:$0xff] }
  0x4b   :  { %1872 = vmatpush1.bf16.msra.mxu0 %v1871_v38  ;;  %v1913_v22 = vpack.c.bf16 %v628_v21, %v627_v20  ;;  %v630_v25 = vld [vmem:[#allocation7 + $0xa8] sm:$0xff]  ;;  %v74_v27 = vld [vmem:[#allocation2 + $0x30] sm:$0xff]  ;;  %v75_v28 = vld [vmem:[#allocation2 + $0x38] sm:$0xff]  ;;  %v150_v21 = vlaneseq }
  0x4c   :  { %1874 = vmatprep.subr.bf16.mxu0 %v1873_v39  ;;  %v1916_v26 = vpack.c.bf16 %v630_v25, %v629_v24  ;;  %v631_v29 = vld [vmem:[#allocation7 + $0xb0] sm:$0xff]  ;;  %v632_v30 = vld [vmem:[#allocation7 + $0xb8] sm:$0xff]  ;;  %v76_v31 = vld [vmem:[#allocation2 + $0x40] sm:$0xff] }
  0x4d   :  { %1952 = vmatpush1.bf16.msra.mxu1 %v1895_v60  ;;  %v1919_v32 = vpack.c.bf16 %v632_v30, %v631_v29  ;;  %v77_v33 = vld [vmem:[#allocation2 + $0x48] sm:$0xff]  ;;  %v78_v34 = vld [vmem:[#allocation2 + $0x50] sm:$0xff]  ;;  %v79_v37 = vld [vmem:[#allocation2 + $0x58] sm:$0xff] }
  0x4e   :  { %1937 = vmatprep.subr.bf16.mxu1 %v2223_v1  ;;  %v634_v36 = vld [vmem:[#allocation7 + $0xc8] sm:$0xff]  ;;  %v80_v39 = vld [vmem:[#allocation2 + $0x60] sm:$0xff]  ;;  %v635_v41 = vld [vmem:[#allocation7 + $0xd0] sm:$0xff] }
  0x4f   :  { %1876 = vmatpush1.bf16.msra.mxu0 %v1875_v47  ;;  %v81_v40 = vld [vmem:[#allocation2 + $0x68] sm:$0xff]  ;;  %v636_v42 = vld [vmem:[#allocation7 + $0xd8] sm:$0xff]  ;;  %v82_v43 = vld [vmem:[#allocation2 + $0x70] sm:$0xff] }
  0x50   :  { %1878 = vmatprep.subr.bf16.mxu0 %v1877_v48  ;;  %v83_v45 = vld [vmem:[#allocation2 + $0x78] sm:$0xff]  ;;  %v637_v46 = vld [vmem:[#allocation7 + $0xe0] sm:$0xff]  ;;  %v638_v47 = vld [vmem:[#allocation7 + $0xe8] sm:$0xff] }
  0x51   :  { %1953 = vmatpush1.bf16.msra.mxu1 %v1898_v2  ;;  %v639_v48 = vld [vmem:[#allocation7 + $0xf0] sm:$0xff]  ;;  %v84_v49 = vld [vmem:[#allocation2 + $0x80] sm:$0xff]  ;;  %v1928_v50 = vpack.c.bf16 %v638_v47, %v637_v46  ;;  %v640_v51 = vld [vmem:[#allocation7 + $0xf8] sm:$0xff] }
  0x52   :  { %1938 = vmatprep.subr.bf16.mxu1 %v2223_v1  ;;  %v1931_v52 = vpack.c.bf16 %v640_v51, %v639_v48  ;;  %v86_v54 = vld [vmem:[#allocation2 + $0x90] sm:$0xff]  ;;  %v87_v55 = vld [vmem:[#allocation2 + $0x98] sm:$0xff]  ;;  %v92_v59 = vld [vmem:[#allocation2 + $0xc0] sm:$0xff] }
  0x53   :  { %1880 = vmatpush1.bf16.msra.mxu0 %v1879_v56  ;;  %v88_v56 = vld [vmem:[#allocation2 + $0xa0] sm:$0xff]  ;;  %v91_v58 = vld [vmem:[#allocation2 + $0xb8] sm:$0xff]  ;;  %v94_v61 = vld [vmem:[#allocation2 + $0xd0] sm:$0xff] }
  0x54   :  { %1882 = vmatprep.subr.bf16.mxu0 %v1881_v57  ;;  %v89_v57 = vld [vmem:[#allocation2 + $0xa8] sm:$0xff]  ;;  %v95_v62 = vld [vmem:[#allocation2 + $0xd8] sm:$0xff]  ;;  %v100_v5 = vld [vmem:[#allocation2 + $0x100] sm:$0xff] }
  0x55   :  { %1954 = vmatpush1.bf16.msra.mxu1 %v1901_v6  ;;  %v99_v4 = vld [vmem:[#allocation2 + $0xf8] sm:$0xff]  ;;  %v104_v9 = vld [vmem:[#allocation2 + $0x120] sm:$0xff] }
  0x56   :  { %1939 = vmatprep.subr.bf16.mxu1 %v2223_v1  ;;  %v103_v8 = vld [vmem:[#allocation2 + $0x118] sm:$0xff]  ;;  %v108_v13 = vld [vmem:[#allocation2 + $0x140] sm:$0xff] }
  0x57   :  { %1884 = vmatpush1.bf16.msra.mxu0 %v1883_v63  ;;  %v96_v63 = vld [vmem:[#allocation2 + $0xe0] sm:$0xff]  ;;  %v107_v12 = vld [vmem:[#allocation2 + $0x138] sm:$0xff] }
  0x58   :  { %1885 = vmatprep.subr.bf16.mxu0 %v2223_v1  ;;  %v111_v16 = vld [vmem:[#allocation2 + $0x158] sm:$0xff]  ;;  %v112_v17 = vld [vmem:[#allocation2 + $0x160] sm:$0xff] }
  0x59   :  { %1955 = vmatpush1.bf16.msra.mxu1 %v1904_v10  ;;  %v115_v20 = vld [vmem:[#allocation2 + $0x178] sm:$0xff]  ;;  %v148_v24 = vld [vmem:[%s3194_s2] sm:$0x3] }
  0x5a   :  { %225 = vmatmul.mubr.f32.vlgmr.msra.gmra.mrb[0].mxu0 %v68_v3  ;;  %1940 = vmatprep.subr.bf16.mxu1 %v2223_v1  ;;  %v98_v3 = vld [vmem:[#allocation2 + $0xf0] sm:$0xff] }
  0x5b   :  { %230 = vmatprep.mubr.f32.mxu0 %v2222_v0  ;;  %1887 = vmatpush1.bf16.msra.mxu0 %v1886_v35  ;;  %v633_v35 = vld [vmem:[#allocation7 + $0xc0] sm:$0xff] }
  0x5c   :  { %1888 = vmatprep.subr.bf16.mxu0 %v2223_v1  ;;  %v1922_v38 = vpack.c.bf16 %v634_v36, %v633_v35 }
  0x5d   :  { %1956 = vmatpush1.bf16.msra.mxu1 %v1907_v14 }
  0x5e   :  { %231 = vmatmul.mubr.f32.gmra.mrb[2].mxu0 %v69_v7  ;;  %1941 = vmatprep.subr.bf16.mxu1 %v2223_v1  ;;  %v102_v7 = vld [vmem:[#allocation2 + $0x110] sm:$0xff] }
  0x5f   :  { %236 = vmatprep.mubr.f32.mxu0 %v2222_v0  ;;  %1890 = vmatpush1.bf16.msra.mxu0 %v1889_v44  ;;  %v1925_v44 = vpack.c.bf16 %v636_v42, %v635_v41 }
  0x60   :  { %1891 = vmatprep.subr.bf16.mxu0 %v2223_v1 }
  0x61   :  { %1957 = vmatpush1.bf16.msra.mxu1 %v1910_v18 }
  0x62   :  { %237 = vmatmul.mubr.f32.gmra.mrb[4].mxu0 %v70_v11  ;;  %1942 = vmatprep.subr.bf16.mxu1 %v2223_v1  ;;  %v106_v11 = vld [vmem:[#allocation2 + $0x130] sm:$0xff] }
  0x63   :  { %242 = vmatprep.mubr.f32.mxu0 %v2222_v0  ;;  %1893 = vmatpush1.bf16.msra.mxu0 %v1892_v53  ;;  %v85_v53 = vld [vmem:[#allocation2 + $0x88] sm:$0xff] }
  0x64   :  { %1894 = vmatprep.subr.bf16.mxu0 %v2223_v1 }
  0x65   :  { %1958 = vmatpush1.bf16.msra.mxu1 %v1913_v22 }
  0x66   :  { %243 = vmatmul.mubr.f32.gmra.mrb[6].mxu0 %v71_v15  ;;  %1943 = vmatprep.subr.bf16.mxu1 %v2223_v1  ;;  %v110_v15 = vld [vmem:[#allocation2 + $0x150] sm:$0xff] }
  0x67   :  { %248 = vmatprep.mubr.f32.mxu0 %v2222_v0  ;;  %1896 = vmatpush1.bf16.msra.mxu0 %v1895_v60  ;;  %v93_v60 = vld [vmem:[#allocation2 + $0xc8] sm:$0xff] }
  0x68   :  { %1897 = vmatprep.subr.bf16.mxu0 %v2223_v1 }
  0x69   :  { %1959 = vmatpush1.bf16.msra.mxu1 %v1916_v26 }
  0x6a   :  { %249 = vmatmul.mubr.f32.gmra.mrb[8].mxu0 %v72_v19  ;;  %1944 = vmatprep.subr.bf16.mxu1 %v2223_v1  ;;  %v114_v19 = vld [vmem:[#allocation2 + $0x170] sm:$0xff] }
  0x6b   :  { %254 = vmatprep.mubr.f32.mxu0 %v2222_v0  ;;  %1899 = vmatpush1.bf16.msra.mxu0 %v1898_v2  ;;  %v97_v2 = vld [vmem:[#allocation2 + $0xe8] sm:$0xff] }
  0x6c   :  { %1900 = vmatprep.subr.bf16.mxu0 %v2223_v1 }
  0x6d   :  { %1960 = vmatpush1.bf16.msra.mxu1 %v1919_v32 }
  0x6e   :  { %255 = vmatmul.mubr.f32.gmra.mrb[10].mxu0 %v73_v23  ;;  %1945 = vmatprep.subr.bf16.mxu1 %v2223_v1 }
  0x6f   :  { %260 = vmatprep.mubr.f32.mxu0 %v2222_v0  ;;  %1902 = vmatpush1.bf16.msra.mxu0 %v1901_v6  ;;  %v101_v6 = vld [vmem:[#allocation2 + $0x108] sm:$0xff] }
  0x70   :  { %1903 = vmatprep.subr.bf16.mxu0 %v2223_v1 }
  0x71   :  { %1961 = vmatpush1.bf16.msra.mxu1 %v1922_v38 }
  0x72   :  { %261 = vmatmul.mubr.f32.gmra.mrb[12].mxu0 %v74_v27  ;;  %1946 = vmatprep.subr.bf16.mxu1 %v2223_v1 }
  0x73   :  { %266 = vmatprep.mubr.f32.mxu0 %v2222_v0  ;;  %1905 = vmatpush1.bf16.msra.mxu0 %v1904_v10  ;;  %v105_v10 = vld [vmem:[#allocation2 + $0x128] sm:$0xff] }
  0x74   :  { %1906 = vmatprep.subr.bf16.mxu0 %v2223_v1 }
  0x75   :  { %1962 = vmatpush1.bf16.msra.mxu1 %v1925_v44 }
  0x76   :  { %267 = vmatmul.mubr.f32.gmra.mrb[14].mxu0 %v75_v28  ;;  %1947 = vmatprep.subr.bf16.mxu1 %v2223_v1 }
  0x77   :  { %272 = vmatprep.mubr.f32.mxu0 %v2222_v0  ;;  %1908 = vmatpush1.bf16.msra.mxu0 %v1907_v14  ;;  %v109_v14 = vld [vmem:[#allocation2 + $0x148] sm:$0xff] }
  0x78   :  { %1909 = vmatprep.subr.bf16.mxu0 %v2223_v1 }
  0x79   :  { %1963 = vmatpush1.bf16.msra.mxu1 %v1928_v50 }
  0x7a   :  { %273 = vmatmul.mubr.f32.gmra.mrb[16].mxu0 %v76_v31  ;;  %1948 = vmatprep.subr.bf16.mxu1 %v2223_v1 }
  0x7b   :  { %278 = vmatprep.mubr.f32.mxu0 %v2222_v0  ;;  %1911 = vmatpush1.bf16.msra.mxu0 %v1910_v18  ;;  %v113_v18 = vld [vmem:[#allocation2 + $0x168] sm:$0xff] }
  0x7c   :  { %1912 = vmatprep.subr.bf16.mxu0 %v2223_v1 }
  0x7d   :  { %1964 = vmatpush1.bf16.msra.mxu1 %v1931_v52 }
  0x7e   :  { %279 = vmatmul.mubr.f32.gmra.mrb[18].mxu0 %v77_v33 }
  0x7f   :  { %284 = vmatprep.mubr.f32.mxu0 %v2222_v0  ;;  %1914 = vmatpush1.bf16.msra.mxu0 %v1913_v22  ;;  %v151_v22 = vshrl.u32 %v150_v21, 7 }
  0x80   :  { %1915 = vmatprep.subr.bf16.mxu0 %v2223_v1 }
  0x81   :  { %v152_v23 = vsub.s32 0, %v151_v22  ;;  %v156_v25 = vsub.s32 1, %v151_v22 }
  0x82   :  { %285 = vmatmul.mubr.f32.gmra.mrb[20].mxu0 %v78_v34 }
  0x83   :  { %290 = vmatprep.mubr.f32.mxu0 %v2222_v0  ;;  %1917 = vmatpush1.bf16.msra.mxu0 %v1916_v26  ;;  %v2390_v26 = vrot.slane %v148_v24, %v152_v23  ;;  %v2392_v27 = vrot.slane %v148_v24, %v156_v25 }
  0x84   :  { %1918 = vmatprep.subr.bf16.mxu0 %v2223_v1 }
  0x86   :  { %291 = vmatmul.mubr.f32.gmra.mrb[22].mxu0 %v79_v37 }
  0x87   :  { %296 = vmatprep.mubr.f32.mxu0 %v2222_v0  ;;  %1920 = vmatpush1.bf16.msra.mxu0 %v1919_v32 }
  0x88   :  { %1921 = vmatprep.subr.bf16.mxu0 %v2223_v1 }
  0x8a   :  { %297 = vmatmul.mubr.f32.gmra.mrb[24].mxu0 %v80_v39 }
  0x8b   :  { %302 = vmatprep.mubr.f32.mxu0 %v2222_v0  ;;  %1923 = vmatpush1.bf16.msra.mxu0 %v1922_v38 }
  0x8c   :  { %1924 = vmatprep.subr.bf16.mxu0 %v2223_v1 }
  0x8e   :  { %303 = vmatmul.mubr.f32.gmra.mrb[26].mxu0 %v81_v40 }
  0x8f   :  { %308 = vmatprep.mubr.f32.mxu0 %v2222_v0  ;;  %1926 = vmatpush1.bf16.msra.mxu0 %v1925_v44 }
  0x90   :  { %1927 = vmatprep.subr.bf16.mxu0 %v2223_v1 }
  0x92   :  { %309 = vmatmul.mubr.f32.gmra.mrb[28].mxu0 %v82_v43 }
  0x93   :  { %314 = vmatprep.mubr.f32.mxu0 %v2222_v0  ;;  %1929 = vmatpush1.bf16.msra.mxu0 %v1928_v50 }
  0x94   :  { %1930 = vmatprep.subr.bf16.mxu0 %v2223_v1  ;;  %v90_v1 = vld [vmem:[#allocation2 + $0xb0] sm:$0xff] }
  0x96   :  { %315 = vmatmul.mubr.f32.gmra.mrb[30].mxu0 %v83_v45 }
  0x97   :  { %320 = vmatprep.mubr.f32.mxu0 %v2222_v0  ;;  %1932 = vmatpush1.bf16.msra.mxu0 %v1931_v52 }
  0x9a   :  { %321 = vmatmul.mubr.f32.gmra.mrb[32].mxu0 %v84_v49 }
  0x9b   :  { %326 = vmatprep.mubr.f32.mxu0 %v2222_v0 }
  0x9e   :  { %327 = vmatmul.mubr.f32.gmra.mrb[34].mxu0 %v85_v53 }
  0x9f   :  { %332 = vmatprep.mubr.f32.mxu0 %v2222_v0 }
  0xa2   :  { %333 = vmatmul.mubr.f32.gmra.mrb[36].mxu0 %v86_v54 }
  0xa3   :  { %338 = vmatprep.mubr.f32.mxu0 %v2222_v0 }
  0xa6   :  { %339 = vmatmul.mubr.f32.gmra.mrb[38].mxu0 %v87_v55 }
  0xa7   :  { %344 = vmatprep.mubr.f32.mxu0 %v2222_v0 }
  0xaa   :  { %345 = vmatmul.mubr.f32.gmra.mrb[40].mxu0 %v88_v56 }
  0xab   :  { %350 = vmatprep.mubr.f32.mxu0 %v2222_v0 }
  0xae   :  { %351 = vmatmul.mubr.f32.gmra.mrb[42].mxu0 %v89_v57 }
  0xaf   :  { %356 = vmatprep.mubr.f32.mxu0 %v2222_v0 }
  0xb2   :  { %357 = vmatmul.mubr.f32.gmra.mrb[44].mxu0 %v90_v1 }
  0xb3   :  { %362 = vmatprep.mubr.f32.mxu0 %v2222_v0 }
  0xb6   :  { %363 = vmatmul.mubr.f32.gmra.mrb[46].mxu0 %v91_v58 }
  0xb7   :  { %368 = vmatprep.mubr.f32.mxu0 %v2222_v0 }
  0xba   :  { %369 = vmatmul.mubr.f32.gmra.mrb[48].mxu0 %v92_v59 }
  0xbb   :  { %374 = vmatprep.mubr.f32.mxu0 %v2222_v0 }
  0xbe   :  { %375 = vmatmul.mubr.f32.gmra.mrb[50].mxu0 %v93_v60 }
  0xbf   :  { %380 = vmatprep.mubr.f32.mxu0 %v2222_v0 }
  0xc2   :  { %381 = vmatmul.mubr.f32.gmra.mrb[52].mxu0 %v94_v61 }
  0xc3   :  { %386 = vmatprep.mubr.f32.mxu0 %v2222_v0 }
  0xc6   :  { %387 = vmatmul.mubr.f32.gmra.mrb[54].mxu0 %v95_v62 }
  0xc7   :  { %392 = vmatprep.mubr.f32.mxu0 %v2222_v0 }
  0xca   :  { %393 = vmatmul.mubr.f32.gmra.mrb[56].mxu0 %v96_v63 }
  0xcb   :  { %398 = vmatprep.mubr.f32.mxu0 %v2222_v0 }
  0xce   :  { %399 = vmatmul.mubr.f32.gmra.mrb[58].mxu0 %v97_v2 }
  0xcf   :  { %404 = vmatprep.mubr.f32.mxu0 %v2222_v0 }
  0xd2   :  { %405 = vmatmul.mubr.f32.gmra.mrb[60].mxu0 %v98_v3 }
  0xd3   :  { %410 = vmatprep.mubr.f32.mxu0 %v2222_v0 }
  0xd6   :  { %411 = vmatmul.mubr.f32.gmra.mrb[62].mxu0 %v99_v4 }
  0xd7   :  { %416 = vmatprep.mubr.f32.mxu0 %v2222_v0 }
  0xda   :  { %417 = vmatmul.mubr.f32.gmra.mrb[64].mxu0 %v100_v5 }
  0xdb   :  { %422 = vmatprep.mubr.f32.mxu0 %v2222_v0 }
  0xde   :  { %423 = vmatmul.mubr.f32.gmra.mrb[66].mxu0 %v101_v6 }
  0xdf   :  { %428 = vmatprep.mubr.f32.mxu0 %v2222_v0 }
  0xe2   :  { %429 = vmatmul.mubr.f32.gmra.mrb[68].mxu0 %v102_v7 }
  0xe3   :  { %434 = vmatprep.mubr.f32.mxu0 %v2222_v0 }
  0xe6   :  { %435 = vmatmul.mubr.f32.gmra.mrb[70].mxu0 %v103_v8 }
  0xe7   :  { %440 = vmatprep.mubr.f32.mxu0 %v2222_v0 }
  0xea   :  { %441 = vmatmul.mubr.f32.gmra.mrb[72].mxu0 %v104_v9 }
  0xeb   :  { %446 = vmatprep.mubr.f32.mxu0 %v2222_v0 }
  0xee   :  { %447 = vmatmul.mubr.f32.gmra.mrb[74].mxu0 %v105_v10 }
  0xef   :  { %452 = vmatprep.mubr.f32.mxu0 %v2222_v0 }
  0xf2   :  { %453 = vmatmul.mubr.f32.gmra.mrb[76].mxu0 %v106_v11 }
  0xf3   :  { %458 = vmatprep.mubr.f32.mxu0 %v2222_v0 }
  0xf6   :  { %459 = vmatmul.mubr.f32.gmra.mrb[78].mxu0 %v107_v12 }
  0xf7   :  { %464 = vmatprep.mubr.f32.mxu0 %v2222_v0 }
  0xfa   :  { %465 = vmatmul.mubr.f32.gmra.mrb[80].mxu0 %v108_v13 }
  0xfb   :  { %470 = vmatprep.mubr.f32.mxu0 %v2222_v0 }
  0xfe   :  { %471 = vmatmul.mubr.f32.gmra.mrb[82].mxu0 %v109_v14 }
  0xff   :  { %476 = vmatprep.mubr.f32.mxu0 %v2222_v0 }
 0x102   :  { %477 = vmatmul.mubr.f32.gmra.mrb[84].mxu0 %v110_v15 }
 0x103   :  { %482 = vmatprep.mubr.f32.mxu0 %v2222_v0 }
 0x106   :  { %483 = vmatmul.mubr.f32.gmra.mrb[86].mxu0 %v111_v16 }
 0x107   :  { %488 = vmatprep.mubr.f32.mxu0 %v2222_v0 }
 0x10a   :  { %489 = vmatmul.mubr.f32.gmra.mrb[88].mxu0 %v112_v17 }
 0x10b   :  { %494 = vmatprep.mubr.f32.mxu0 %v2222_v0 }
 0x10e   :  { %495 = vmatmul.mubr.f32.gmra.mrb[90].mxu0 %v113_v18 }
 0x10f   :  { %500 = vmatprep.mubr.f32.mxu0 %v2222_v0 }
 0x112   :  { %501 = vmatmul.mubr.f32.gmra.mrb[92].mxu0 %v114_v19 }
 0x113   :  { %506 = vmatprep.mubr.f32.mxu0 %v2222_v0 }
 0x116   :  { %507 = vmatmul.mubr.f32.gmra.mrb[94].mxu0 %v115_v20 }
 0x12d   :  { %v226_v28 = vpop.f32.mrb[0].mxu0 }
 0x12e   :  { %v227_v29 = vadd.f32 %v226_v28, %v2390_v26  ;;  %v228_v30 = vpop.f32.mrb[1].mxu0 }
 0x12f   :  { %v229_v0 = vadd.f32 %v228_v30, %v2392_v27 }
 0x130   :  { %v513_v33 = vmax.f32 %v227_v29, 0.0 }
 0x131   :  { %v514_v31 = vmax.f32 %v229_v0, 0.0  ;;  %v232_v32 = vpop.f32.mrb[2].mxu0 }
 0x132   :  { %v233_v34 = vadd.f32 %v232_v32, %v2390_v26  ;;  %v234_v35 = vpop.f32.mrb[3].mxu0 }
 0x133   :  { %v235_v36 = vadd.f32 %v234_v35, %v2392_v27  ;;  %712 = vmatprep.mubr.f32.mxu0 %v514_v31 }
 0x134   :  { %713 = vmatmul.mubr.f32.vlgmr.msra.gmra.mrb[96].mxu0 %v513_v33  ;;  %v515_v39 = vmax.f32 %v233_v34, 0.0 }
 0x135   :  { %v516_v37 = vmax.f32 %v235_v36, 0.0  ;;  %v238_v38 = vpop.f32.mrb[4].mxu0 }
 0x136   :  { %v239_v40 = vadd.f32 %v238_v38, %v2390_v26  ;;  %v240_v41 = vpop.f32.mrb[5].mxu0 }
 0x137   :  { %v241_v42 = vadd.f32 %v240_v41, %v2392_v27  ;;  %717 = vmatprep.mubr.f32.mxu0 %v516_v37 }
 0x138   :  { %v517_v43 = vmax.f32 %v239_v40, 0.0  ;;  %718 = vmatmul.mubr.f32.gmra.mrb[98].mxu0 %v515_v39 }
 0x139   :  { %v518_v44 = vmax.f32 %v241_v42, 0.0  ;;  %v244_v45 = vpop.f32.mrb[6].mxu0 }
 0x13a   :  { %v245_v46 = vadd.f32 %v244_v45, %v2390_v26  ;;  %v246_v47 = vpop.f32.mrb[7].mxu0 }
 0x13b   :  { %v247_v48 = vadd.f32 %v246_v47, %v2392_v27  ;;  %722 = vmatprep.mubr.f32.mxu0 %v518_v44 }
 0x13c   :  { %v519_v49 = vmax.f32 %v245_v46, 0.0  ;;  %723 = vmatmul.mubr.f32.gmra.mrb[100].mxu0 %v517_v43 }
 0x13d   :  { %v520_v50 = vmax.f32 %v247_v48, 0.0  ;;  %v250_v51 = vpop.f32.mrb[8].mxu0 }
 0x13e   :  { %v251_v52 = vadd.f32 %v250_v51, %v2390_v26  ;;  %v252_v53 = vpop.f32.mrb[9].mxu0 }
 0x13f   :  { %727 = vmatprep.mubr.f32.mxu0 %v520_v50  ;;  %v253_v54 = vadd.f32 %v252_v53, %v2392_v27 }
 0x140   :  { %v521_v55 = vmax.f32 %v251_v52, 0.0  ;;  %728 = vmatmul.mubr.f32.gmra.mrb[102].mxu0 %v519_v49 }
 0x141   :  { %v256_v56 = vpop.f32.mrb[10].mxu0  ;;  %v522_v57 = vmax.f32 %v253_v54, 0.0 }
 0x142   :  { %v257_v1 = vadd.f32 %v256_v56, %v2390_v26  ;;  %v258_v58 = vpop.f32.mrb[11].mxu0 }
 0x143   :  { %v259_v59 = vadd.f32 %v258_v58, %v2392_v27  ;;  %732 = vmatprep.mubr.f32.mxu1 %v522_v57 }
 0x144   :  { %v523_v60 = vmax.f32 %v257_v1, 0.0  ;;  %733 = vmatmul.mubr.f32.vlgmr.msra.gmra.mrb[0].mxu1 %v521_v55 }
 0x145   :  { %v524_v61 = vmax.f32 %v259_v59, 0.0  ;;  %v262_v62 = vpop.f32.mrb[12].mxu0 }
 0x146   :  { %v263_v63 = vadd.f32 %v262_v62, %v2390_v26  ;;  %v264_v2 = vpop.f32.mrb[13].mxu0 }
 0x147   :  { %v265_v3 = vadd.f32 %v264_v2, %v2392_v27  ;;  %737 = vmatprep.mubr.f32.mxu1 %v524_v61 }
 0x148   :  { %v525_v4 = vmax.f32 %v263_v63, 0.0  ;;  %738 = vmatmul.mubr.f32.gmra.mrb[2].mxu1 %v523_v60 }
 0x149   :  { %v526_v5 = vmax.f32 %v265_v3, 0.0  ;;  %v268_v6 = vpop.f32.mrb[14].mxu0 }
 0x14a   :  { %v269_v7 = vadd.f32 %v268_v6, %v2390_v26  ;;  %v270_v8 = vpop.f32.mrb[15].mxu0 }
 0x14b   :  { %v271_v9 = vadd.f32 %v270_v8, %v2392_v27  ;;  %742 = vmatprep.mubr.f32.mxu1 %v526_v5 }
 0x14c   :  { %v527_v10 = vmax.f32 %v269_v7, 0.0  ;;  %743 = vmatmul.mubr.f32.gmra.mrb[4].mxu1 %v525_v4 }
 0x14d   :  { %v528_v11 = vmax.f32 %v271_v9, 0.0  ;;  %v274_v12 = vpop.f32.mrb[16].mxu0 }
 0x14e   :  { %v275_v13 = vadd.f32 %v274_v12, %v2390_v26  ;;  %v276_v14 = vpop.f32.mrb[17].mxu0 }
 0x14f   :  { %v277_v15 = vadd.f32 %v276_v14, %v2392_v27  ;;  %747 = vmatprep.mubr.f32.mxu1 %v528_v11 }
 0x150   :  { %v529_v16 = vmax.f32 %v275_v13, 0.0  ;;  %748 = vmatmul.mubr.f32.gmra.mrb[6].mxu1 %v527_v10 }
 0x151   :  { %v530_v17 = vmax.f32 %v277_v15, 0.0  ;;  %v280_v18 = vpop.f32.mrb[18].mxu0 }
 0x152   :  { %v281_v19 = vadd.f32 %v280_v18, %v2390_v26  ;;  %v282_v20 = vpop.f32.mrb[19].mxu0 }
 0x153   :  { %v283_v21 = vadd.f32 %v282_v20, %v2392_v27  ;;  %752 = vmatprep.mubr.f32.mxu1 %v530_v17 }
 0x154   :  { %v531_v22 = vmax.f32 %v281_v19, 0.0  ;;  %753 = vmatmul.mubr.f32.gmra.mrb[8].mxu1 %v529_v16 }
 0x155   :  { %v532_v23 = vmax.f32 %v283_v21, 0.0  ;;  %v286_v24 = vpop.f32.mrb[20].mxu0 }
 0x156   :  { %v287_v25 = vadd.f32 %v286_v24, %v2390_v26  ;;  %v288_v28 = vpop.f32.mrb[21].mxu0 }
 0x157   :  { %v289_v29 = vadd.f32 %v288_v28, %v2392_v27  ;;  %757 = vmatprep.mubr.f32.mxu1 %v532_v23 }
 0x158   :  { %v533_v30 = vmax.f32 %v287_v25, 0.0  ;;  %758 = vmatmul.mubr.f32.gmra.mrb[10].mxu1 %v531_v22 }
 0x159   :  { %v534_v0 = vmax.f32 %v289_v29, 0.0  ;;  %v292_v31 = vpop.f32.mrb[22].mxu0 }
 0x15a   :  { %v293_v32 = vadd.f32 %v292_v31, %v2390_v26  ;;  %v294_v33 = vpop.f32.mrb[23].mxu0 }
 0x15b   :  { %v295_v34 = vadd.f32 %v294_v33, %v2392_v27  ;;  %762 = vmatprep.mubr.f32.mxu1 %v534_v0 }
 0x15c   :  { %v535_v35 = vmax.f32 %v293_v32, 0.0  ;;  %763 = vmatmul.mubr.f32.gmra.mrb[12].mxu1 %v533_v30 }
 0x15d   :  { %v536_v36 = vmax.f32 %v295_v34, 0.0  ;;  %v298_v37 = vpop.f32.mrb[24].mxu0 }
 0x15e   :  { %v299_v38 = vadd.f32 %v298_v37, %v2390_v26  ;;  %v300_v39 = vpop.f32.mrb[25].mxu0 }
 0x15f   :  { %v301_v40 = vadd.f32 %v300_v39, %v2392_v27  ;;  %767 = vmatprep.mubr.f32.mxu1 %v536_v36 }
 0x160   :  { %v537_v41 = vmax.f32 %v299_v38, 0.0  ;;  %768 = vmatmul.mubr.f32.gmra.mrb[14].mxu1 %v535_v35 }
 0x161   :  { %v538_v42 = vmax.f32 %v301_v40, 0.0  ;;  %v304_v43 = vpop.f32.mrb[26].mxu0 }
 0x162   :  { %v305_v44 = vadd.f32 %v304_v43, %v2390_v26  ;;  %v306_v45 = vpop.f32.mrb[27].mxu0 }
 0x163   :  { %v307_v46 = vadd.f32 %v306_v45, %v2392_v27  ;;  %772 = vmatprep.mubr.f32.mxu1 %v538_v42 }
 0x164   :  { %v539_v47 = vmax.f32 %v305_v44, 0.0  ;;  %773 = vmatmul.mubr.f32.gmra.mrb[16].mxu1 %v537_v41 }
 0x165   :  { %v540_v48 = vmax.f32 %v307_v46, 0.0  ;;  %v310_v49 = vpop.f32.mrb[28].mxu0 }
 0x166   :  { %v311_v50 = vadd.f32 %v310_v49, %v2390_v26  ;;  %v312_v51 = vpop.f32.mrb[29].mxu0 }
 0x167   :  { %v313_v52 = vadd.f32 %v312_v51, %v2392_v27  ;;  %777 = vmatprep.mubr.f32.mxu1 %v540_v48 }
 0x168   :  { %v541_v53 = vmax.f32 %v311_v50, 0.0  ;;  %778 = vmatmul.mubr.f32.gmra.mrb[18].mxu1 %v539_v47 }
 0x169   :  { %v542_v54 = vmax.f32 %v313_v52, 0.0  ;;  %v316_v55 = vpop.f32.mrb[30].mxu0 }
 0x16a   :  { %v317_v56 = vadd.f32 %v316_v55, %v2390_v26  ;;  %v318_v57 = vpop.f32.mrb[31].mxu0 }
 0x16b   :  { %v319_v1 = vadd.f32 %v318_v57, %v2392_v27  ;;  %782 = vmatprep.mubr.f32.mxu1 %v542_v54 }
 0x16c   :  { %v543_v58 = vmax.f32 %v317_v56, 0.0  ;;  %783 = vmatmul.mubr.f32.gmra.mrb[20].mxu1 %v541_v53 }
 0x16d   :  { %v544_v59 = vmax.f32 %v319_v1, 0.0  ;;  %v322_v60 = vpop.f32.mrb[32].mxu0 }
 0x16e   :  { %v323_v61 = vadd.f32 %v322_v60, %v2390_v26  ;;  %v324_v62 = vpop.f32.mrb[33].mxu0 }
 0x16f   :  { %v325_v63 = vadd.f32 %v324_v62, %v2392_v27  ;;  %787 = vmatprep.mubr.f32.mxu1 %v544_v59 }
 0x170   :  { %v545_v2 = vmax.f32 %v323_v61, 0.0  ;;  %788 = vmatmul.mubr.f32.gmra.mrb[22].mxu1 %v543_v58 }
 0x171   :  { %v546_v3 = vmax.f32 %v325_v63, 0.0  ;;  %v328_v4 = vpop.f32.mrb[34].mxu0 }
 0x172   :  { %v329_v5 = vadd.f32 %v328_v4, %v2390_v26  ;;  %v330_v6 = vpop.f32.mrb[35].mxu0 }
 0x173   :  { %v331_v7 = vadd.f32 %v330_v6, %v2392_v27  ;;  %792 = vmatprep.mubr.f32.mxu1 %v546_v3 }
 0x174   :  { %v547_v8 = vmax.f32 %v329_v5, 0.0  ;;  %793 = vmatmul.mubr.f32.gmra.mrb[24].mxu1 %v545_v2 }
 0x175   :  { %v548_v9 = vmax.f32 %v331_v7, 0.0  ;;  %v334_v10 = vpop.f32.mrb[36].mxu0 }
 0x176   :  { %v335_v11 = vadd.f32 %v334_v10, %v2390_v26  ;;  %v336_v12 = vpop.f32.mrb[37].mxu0 }
 0x177   :  { %v337_v13 = vadd.f32 %v336_v12, %v2392_v27  ;;  %797 = vmatprep.mubr.f32.mxu1 %v548_v9 }
 0x178   :  { %v549_v14 = vmax.f32 %v335_v11, 0.0  ;;  %798 = vmatmul.mubr.f32.gmra.mrb[26].mxu1 %v547_v8 }
 0x179   :  { %v550_v15 = vmax.f32 %v337_v13, 0.0  ;;  %v340_v16 = vpop.f32.mrb[38].mxu0 }
 0x17a   :  { %v341_v17 = vadd.f32 %v340_v16, %v2390_v26  ;;  %v342_v18 = vpop.f32.mrb[39].mxu0 }
 0x17b   :  { %v343_v19 = vadd.f32 %v342_v18, %v2392_v27  ;;  %802 = vmatprep.mubr.f32.mxu1 %v550_v15 }
 0x17c   :  { %v551_v20 = vmax.f32 %v341_v17, 0.0  ;;  %803 = vmatmul.mubr.f32.gmra.mrb[28].mxu1 %v549_v14 }
 0x17d   :  { %v552_v21 = vmax.f32 %v343_v19, 0.0  ;;  %v346_v22 = vpop.f32.mrb[40].mxu0 }
 0x17e   :  { %v347_v23 = vadd.f32 %v346_v22, %v2390_v26  ;;  %v348_v24 = vpop.f32.mrb[41].mxu0 }
 0x17f   :  { %v349_v25 = vadd.f32 %v348_v24, %v2392_v27  ;;  %807 = vmatprep.mubr.f32.mxu1 %v552_v21 }
 0x180   :  { %v553_v28 = vmax.f32 %v347_v23, 0.0  ;;  %808 = vmatmul.mubr.f32.gmra.mrb[30].mxu1 %v551_v20 }
 0x181   :  { %v554_v29 = vmax.f32 %v349_v25, 0.0  ;;  %v352_v30 = vpop.f32.mrb[42].mxu0 }
 0x182   :  { %v353_v0 = vadd.f32 %v352_v30, %v2390_v26  ;;  %v354_v31 = vpop.f32.mrb[43].mxu0 }
 0x183   :  { %v355_v32 = vadd.f32 %v354_v31, %v2392_v27  ;;  %812 = vmatprep.mubr.f32.mxu1 %v554_v29 }
 0x184   :  { %v555_v33 = vmax.f32 %v353_v0, 0.0  ;;  %813 = vmatmul.mubr.f32.gmra.mrb[32].mxu1 %v553_v28 }
 0x185   :  { %v556_v34 = vmax.f32 %v355_v32, 0.0  ;;  %v358_v35 = vpop.f32.mrb[44].mxu0 }
 0x186   :  { %v359_v36 = vadd.f32 %v358_v35, %v2390_v26  ;;  %v360_v37 = vpop.f32.mrb[45].mxu0 }
 0x187   :  { %v361_v38 = vadd.f32 %v360_v37, %v2392_v27  ;;  %817 = vmatprep.mubr.f32.mxu1 %v556_v34 }
 0x188   :  { %v557_v39 = vmax.f32 %v359_v36, 0.0  ;;  %818 = vmatmul.mubr.f32.gmra.mrb[34].mxu1 %v555_v33 }
 0x189   :  { %v558_v40 = vmax.f32 %v361_v38, 0.0  ;;  %v364_v41 = vpop.f32.mrb[46].mxu0 }
 0x18a   :  { %v365_v42 = vadd.f32 %v364_v41, %v2390_v26  ;;  %v366_v43 = vpop.f32.mrb[47].mxu0 }
 0x18b   :  { %v367_v44 = vadd.f32 %v366_v43, %v2392_v27  ;;  %822 = vmatprep.mubr.f32.mxu1 %v558_v40 }
 0x18c   :  { %v559_v45 = vmax.f32 %v365_v42, 0.0  ;;  %823 = vmatmul.mubr.f32.gmra.mrb[36].mxu1 %v557_v39 }
 0x18d   :  { %v560_v46 = vmax.f32 %v367_v44, 0.0  ;;  %v370_v47 = vpop.f32.mrb[48].mxu0 }
 0x18e   :  { %v371_v48 = vadd.f32 %v370_v47, %v2390_v26  ;;  %v372_v49 = vpop.f32.mrb[49].mxu0 }
 0x18f   :  { %v373_v50 = vadd.f32 %v372_v49, %v2392_v27  ;;  %827 = vmatprep.mubr.f32.mxu1 %v560_v46 }
 0x190   :  { %v561_v51 = vmax.f32 %v371_v48, 0.0  ;;  %828 = vmatmul.mubr.f32.gmra.mrb[38].mxu1 %v559_v45 }
 0x191   :  { %v562_v52 = vmax.f32 %v373_v50, 0.0  ;;  %v376_v53 = vpop.f32.mrb[50].mxu0 }
 0x192   :  { %v377_v54 = vadd.f32 %v376_v53, %v2390_v26  ;;  %v378_v55 = vpop.f32.mrb[51].mxu0 }
 0x193   :  { %v379_v56 = vadd.f32 %v378_v55, %v2392_v27  ;;  %832 = vmatprep.mubr.f32.mxu1 %v562_v52 }
 0x194   :  { %v563_v57 = vmax.f32 %v377_v54, 0.0  ;;  %833 = vmatmul.mubr.f32.gmra.mrb[40].mxu1 %v561_v51 }
 0x195   :  { %v564_v1 = vmax.f32 %v379_v56, 0.0  ;;  %v382_v58 = vpop.f32.mrb[52].mxu0 }
 0x196   :  { %v383_v59 = vadd.f32 %v382_v58, %v2390_v26  ;;  %v384_v60 = vpop.f32.mrb[53].mxu0 }
 0x197   :  { %v385_v61 = vadd.f32 %v384_v60, %v2392_v27  ;;  %837 = vmatprep.mubr.f32.mxu1 %v564_v1 }
 0x198   :  { %v565_v62 = vmax.f32 %v383_v59, 0.0  ;;  %838 = vmatmul.mubr.f32.gmra.mrb[42].mxu1 %v563_v57 }
 0x199   :  { %v566_v63 = vmax.f32 %v385_v61, 0.0  ;;  %v388_v2 = vpop.f32.mrb[54].mxu0 }
 0x19a   :  { %v389_v3 = vadd.f32 %v388_v2, %v2390_v26  ;;  %v390_v4 = vpop.f32.mrb[55].mxu0 }
 0x19b   :  { %v391_v5 = vadd.f32 %v390_v4, %v2392_v27  ;;  %842 = vmatprep.mubr.f32.mxu1 %v566_v63 }
 0x19c   :  { %v567_v6 = vmax.f32 %v389_v3, 0.0  ;;  %843 = vmatmul.mubr.f32.gmra.mrb[44].mxu1 %v565_v62 }
 0x19d   :  { %v568_v7 = vmax.f32 %v391_v5, 0.0  ;;  %v394_v8 = vpop.f32.mrb[56].mxu0 }
 0x19e   :  { %v395_v9 = vadd.f32 %v394_v8, %v2390_v26  ;;  %v396_v10 = vpop.f32.mrb[57].mxu0 }
 0x19f   :  { %v397_v11 = vadd.f32 %v396_v10, %v2392_v27  ;;  %847 = vmatprep.mubr.f32.mxu1 %v568_v7 }
 0x1a0   :  { %v569_v12 = vmax.f32 %v395_v9, 0.0  ;;  %848 = vmatmul.mubr.f32.gmra.mrb[46].mxu1 %v567_v6 }
 0x1a1   :  { %v570_v13 = vmax.f32 %v397_v11, 0.0  ;;  %v400_v14 = vpop.f32.mrb[58].mxu0 }
 0x1a2   :  { %v401_v15 = vadd.f32 %v400_v14, %v2390_v26  ;;  %v402_v16 = vpop.f32.mrb[59].mxu0 }
 0x1a3   :  { %v403_v17 = vadd.f32 %v402_v16, %v2392_v27  ;;  %852 = vmatprep.mubr.f32.mxu1 %v570_v13 }
 0x1a4   :  { %v571_v18 = vmax.f32 %v401_v15, 0.0  ;;  %853 = vmatmul.mubr.f32.gmra.mrb[48].mxu1 %v569_v12 }
 0x1a5   :  { %v572_v19 = vmax.f32 %v403_v17, 0.0  ;;  %v406_v20 = vpop.f32.mrb[60].mxu0 }
 0x1a6   :  { %v407_v21 = vadd.f32 %v406_v20, %v2390_v26  ;;  %v408_v22 = vpop.f32.mrb[61].mxu0 }
 0x1a7   :  { %v409_v23 = vadd.f32 %v408_v22, %v2392_v27  ;;  %857 = vmatprep.mubr.f32.mxu1 %v572_v19 }
 0x1a8   :  { %v573_v24 = vmax.f32 %v407_v21, 0.0  ;;  %858 = vmatmul.mubr.f32.gmra.mrb[50].mxu1 %v571_v18 }
 0x1a9   :  { %v574_v25 = vmax.f32 %v409_v23, 0.0  ;;  %v412_v28 = vpop.f32.mrb[62].mxu0 }
 0x1aa   :  { %v413_v29 = vadd.f32 %v412_v28, %v2390_v26  ;;  %v414_v30 = vpop.f32.mrb[63].mxu0 }
 0x1ab   :  { %v415_v0 = vadd.f32 %v414_v30, %v2392_v27  ;;  %862 = vmatprep.mubr.f32.mxu1 %v574_v25 }
 0x1ac   :  { %v575_v31 = vmax.f32 %v413_v29, 0.0  ;;  %863 = vmatmul.mubr.f32.gmra.mrb[52].mxu1 %v573_v24 }
 0x1ad   :  { %v576_v32 = vmax.f32 %v415_v0, 0.0  ;;  %v418_v33 = vpop.f32.mrb[64].mxu0 }
 0x1ae   :  { %v419_v34 = vadd.f32 %v418_v33, %v2390_v26  ;;  %v420_v35 = vpop.f32.mrb[65].mxu0 }
 0x1af   :  { %v421_v36 = vadd.f32 %v420_v35, %v2392_v27  ;;  %867 = vmatprep.mubr.f32.mxu1 %v576_v32 }
 0x1b0   :  { %v577_v37 = vmax.f32 %v419_v34, 0.0  ;;  %868 = vmatmul.mubr.f32.gmra.mrb[54].mxu1 %v575_v31 }
 0x1b1   :  { %v578_v38 = vmax.f32 %v421_v36, 0.0  ;;  %v424_v39 = vpop.f32.mrb[66].mxu0 }
 0x1b2   :  { %v425_v40 = vadd.f32 %v424_v39, %v2390_v26  ;;  %v426_v41 = vpop.f32.mrb[67].mxu0 }
 0x1b3   :  { %v427_v42 = vadd.f32 %v426_v41, %v2392_v27  ;;  %872 = vmatprep.mubr.f32.mxu1 %v578_v38 }
 0x1b4   :  { %v579_v43 = vmax.f32 %v425_v40, 0.0  ;;  %873 = vmatmul.mubr.f32.gmra.mrb[56].mxu1 %v577_v37 }
 0x1b5   :  { %v580_v44 = vmax.f32 %v427_v42, 0.0  ;;  %v430_v45 = vpop.f32.mrb[68].mxu0 }
 0x1b6   :  { %v431_v46 = vadd.f32 %v430_v45, %v2390_v26  ;;  %v432_v47 = vpop.f32.mrb[69].mxu0 }
 0x1b7   :  { %v433_v48 = vadd.f32 %v432_v47, %v2392_v27  ;;  %877 = vmatprep.mubr.f32.mxu1 %v580_v44 }
 0x1b8   :  { %v581_v49 = vmax.f32 %v431_v46, 0.0  ;;  %878 = vmatmul.mubr.f32.gmra.mrb[58].mxu1 %v579_v43 }
 0x1b9   :  { %v582_v50 = vmax.f32 %v433_v48, 0.0  ;;  %v436_v51 = vpop.f32.mrb[70].mxu0 }
 0x1ba   :  { %v437_v52 = vadd.f32 %v436_v51, %v2390_v26  ;;  %v438_v53 = vpop.f32.mrb[71].mxu0 }
 0x1bb   :  { %v439_v54 = vadd.f32 %v438_v53, %v2392_v27  ;;  %882 = vmatprep.mubr.f32.mxu1 %v582_v50 }
 0x1bc   :  { %v583_v55 = vmax.f32 %v437_v52, 0.0  ;;  %883 = vmatmul.mubr.f32.gmra.mrb[60].mxu1 %v581_v49 }
 0x1bd   :  { %v584_v56 = vmax.f32 %v439_v54, 0.0  ;;  %v442_v57 = vpop.f32.mrb[72].mxu0 }
 0x1be   :  { %v443_v1 = vadd.f32 %v442_v57, %v2390_v26  ;;  %v444_v58 = vpop.f32.mrb[73].mxu0 }
 0x1bf   :  { %v445_v59 = vadd.f32 %v444_v58, %v2392_v27  ;;  %887 = vmatprep.mubr.f32.mxu1 %v584_v56 }
 0x1c0   :  { %v585_v60 = vmax.f32 %v443_v1, 0.0  ;;  %888 = vmatmul.mubr.f32.gmra.mrb[62].mxu1 %v583_v55 }
 0x1c1   :  { %v586_v61 = vmax.f32 %v445_v59, 0.0  ;;  %v448_v62 = vpop.f32.mrb[74].mxu0 }
 0x1c2   :  { %v449_v63 = vadd.f32 %v448_v62, %v2390_v26  ;;  %v450_v2 = vpop.f32.mrb[75].mxu0 }
 0x1c3   :  { %v451_v3 = vadd.f32 %v450_v2, %v2392_v27  ;;  %892 = vmatprep.mubr.f32.mxu1 %v586_v61 }
 0x1c4   :  { %v587_v4 = vmax.f32 %v449_v63, 0.0  ;;  %893 = vmatmul.mubr.f32.gmra.mrb[64].mxu1 %v585_v60 }
 0x1c5   :  { %v588_v5 = vmax.f32 %v451_v3, 0.0  ;;  %v454_v6 = vpop.f32.mrb[76].mxu0 }
 0x1c6   :  { %v455_v7 = vadd.f32 %v454_v6, %v2390_v26  ;;  %v456_v8 = vpop.f32.mrb[77].mxu0 }
 0x1c7   :  { %v457_v9 = vadd.f32 %v456_v8, %v2392_v27  ;;  %897 = vmatprep.mubr.f32.mxu1 %v588_v5  ;;  %v2071_v8 = vld [vmem:[#allocation2] sm:$0xff] }
 0x1c8   :  { %v589_v10 = vmax.f32 %v455_v7, 0.0  ;;  %898 = vmatmul.mubr.f32.gmra.mrb[66].mxu1 %v587_v4  ;;  %v2493_v4 = vld [vmem:[%s3196_s4] ss:$0 sm:$0xff] }
 0x1c9   :  { %v590_v11 = vmax.f32 %v457_v9, 0.0  ;;  %v460_v12 = vpop.f32.mrb[78].mxu0 }
 0x1ca   :  { %v461_v13 = vadd.f32 %v460_v12, %v2390_v26  ;;  %v462_v14 = vpop.f32.mrb[79].mxu0 }
 0x1cb   :  { %v463_v15 = vadd.f32 %v462_v14, %v2392_v27  ;;  %902 = vmatprep.mubr.f32.mxu1 %v590_v11  ;;  %v2072_v11 = vld [vmem:[#allocation2 + $0x8] sm:$0xff] }
 0x1cc   :  { %v591_v16 = vmax.f32 %v461_v13, 0.0  ;;  %903 = vmatmul.mubr.f32.gmra.mrb[68].mxu1 %v589_v10 }
 0x1cd   :  { %v592_v17 = vmax.f32 %v463_v15, 0.0  ;;  %v466_v18 = vpop.f32.mrb[80].mxu0 }
 0x1ce   :  { %v467_v19 = vadd.f32 %v466_v18, %v2390_v26  ;;  %v468_v20 = vpop.f32.mrb[81].mxu0  ;;  %v2073_v18 = vld [vmem:[#allocation2 + $0x10] sm:$0xff] }
 0x1cf   :  { %v469_v21 = vadd.f32 %v468_v20, %v2392_v27  ;;  %907 = vmatprep.mubr.f32.mxu1 %v592_v17 }
 0x1d0   :  { %v593_v22 = vmax.f32 %v467_v19, 0.0  ;;  %908 = vmatmul.mubr.f32.gmra.mrb[70].mxu1 %v591_v16 }
 0x1d1   :  { %v594_v23 = vmax.f32 %v469_v21, 0.0  ;;  %v472_v24 = vpop.f32.mrb[82].mxu0 }
 0x1d2   :  { %v473_v25 = vadd.f32 %v472_v24, %v2390_v26  ;;  %v474_v28 = vpop.f32.mrb[83].mxu0 }
 0x1d3   :  { %v475_v29 = vadd.f32 %v474_v28, %v2392_v27  ;;  %912 = vmatprep.mubr.f32.mxu1 %v594_v23 }
 0x1d4   :  { %v595_v30 = vmax.f32 %v473_v25, 0.0  ;;  %913 = vmatmul.mubr.f32.gmra.mrb[72].mxu1 %v593_v22  ;;  %v2074_v25 = vld [vmem:[#allocation2 + $0x18] sm:$0xff] }
 0x1d5   :  { %v596_v0 = vmax.f32 %v475_v29, 0.0  ;;  %v478_v31 = vpop.f32.mrb[84].mxu0 }
 0x1d6   :  { %v479_v32 = vadd.f32 %v478_v31, %v2390_v26  ;;  %v480_v33 = vpop.f32.mrb[85].mxu0 }
 0x1d7   :  { %v481_v34 = vadd.f32 %v480_v33, %v2392_v27  ;;  %917 = vmatprep.mubr.f32.mxu1 %v596_v0  ;;  %v2075_v0 = vld [vmem:[#allocation2 + $0x20] sm:$0xff] }
 0x1d8   :  { %v597_v35 = vmax.f32 %v479_v32, 0.0  ;;  %918 = vmatmul.mubr.f32.gmra.mrb[74].mxu1 %v595_v30 }
 0x1d9   :  { %v598_v36 = vmax.f32 %v481_v34, 0.0  ;;  %v484_v37 = vpop.f32.mrb[86].mxu0 }
 0x1da   :  { %v485_v38 = vadd.f32 %v484_v37, %v2390_v26  ;;  %v486_v39 = vpop.f32.mrb[87].mxu0 }
 0x1db   :  { %v487_v40 = vadd.f32 %v486_v39, %v2392_v27  ;;  %922 = vmatprep.mubr.f32.mxu1 %v598_v36 }
 0x1dc   :  { %v599_v41 = vmax.f32 %v485_v38, 0.0  ;;  %923 = vmatmul.mubr.f32.gmra.mrb[76].mxu1 %v597_v35  ;;  %v2076_v38 = vld [vmem:[#allocation2 + $0x28] sm:$0xff] }
 0x1dd   :  { %v600_v42 = vmax.f32 %v487_v40, 0.0  ;;  %v490_v43 = vpop.f32.mrb[88].mxu0 }
 0x1de   :  { %v491_v44 = vadd.f32 %v490_v43, %v2390_v26  ;;  %v492_v45 = vpop.f32.mrb[89].mxu0 }
 0x1df   :  { %v493_v46 = vadd.f32 %v492_v45, %v2392_v27  ;;  %927 = vmatprep.mubr.f32.mxu1 %v600_v42  ;;  %v2077_v42 = vld [vmem:[#allocation2 + $0x30] sm:$0xff] }
 0x1e0   :  { %v601_v47 = vmax.f32 %v491_v44, 0.0  ;;  %928 = vmatmul.mubr.f32.gmra.mrb[78].mxu1 %v599_v41 }
 0x1e1   :  { %v602_v48 = vmax.f32 %v493_v46, 0.0  ;;  %v496_v49 = vpop.f32.mrb[90].mxu0 }
 0x1e2   :  { %v497_v50 = vadd.f32 %v496_v49, %v2390_v26  ;;  %v498_v51 = vpop.f32.mrb[91].mxu0 }
 0x1e3   :  { %v499_v52 = vadd.f32 %v498_v51, %v2392_v27  ;;  %932 = vmatprep.mubr.f32.mxu1 %v602_v48 }
 0x1e4   :  { %v603_v53 = vmax.f32 %v497_v50, 0.0  ;;  %933 = vmatmul.mubr.f32.gmra.mrb[80].mxu1 %v601_v47  ;;  %v2078_v50 = vld [vmem:[#allocation2 + $0x38] sm:$0xff] }
 0x1e5   :  { %v604_v54 = vmax.f32 %v499_v52, 0.0  ;;  %v502_v55 = vpop.f32.mrb[92].mxu0 }
 0x1e6   :  { %v503_v56 = vadd.f32 %v502_v55, %v2390_v26  ;;  %v504_v57 = vpop.f32.mrb[93].mxu0 }
 0x1e7   :  { %v505_v1 = vadd.f32 %v504_v57, %v2392_v27  ;;  %937 = vmatprep.mubr.f32.mxu1 %v604_v54  ;;  %v2079_v54 = vld [vmem:[#allocation2 + $0x40] sm:$0xff] }
 0x1e8   :  { %v605_v58 = vmax.f32 %v503_v56, 0.0  ;;  %938 = vmatmul.mubr.f32.gmra.mrb[82].mxu1 %v603_v53 }
 0x1e9   :  { %v606_v59 = vmax.f32 %v505_v1, 0.0  ;;  %v508_v60 = vpop.f32.mrb[94].mxu0 }
 0x1ea   :  { %v509_v61 = vadd.f32 %v508_v60, %v2390_v26  ;;  %v510_v62 = vpop.f32.mrb[95].mxu0 }
 0x1eb   :  { %v511_v63 = vadd.f32 %v510_v62, %v2392_v27  ;;  %942 = vmatprep.mubr.f32.mxu1 %v606_v59 }
 0x1ec   :  { %v607_v2 = vmax.f32 %v509_v61, 0.0  ;;  %943 = vmatmul.mubr.f32.gmra.mrb[84].mxu1 %v605_v58  ;;  %v2080_v61 = vld [vmem:[#allocation2 + $0x48] sm:$0xff] }
 0x1ed   :  { %v608_v3 = vmax.f32 %v511_v63, 0.0 }
 0x1ef   :  { %947 = vmatprep.mubr.f32.mxu1 %v608_v3  ;;  %v2081_v3 = vld [vmem:[#allocation2 + $0x50] sm:$0xff] }
 0x1f0   :  { %948 = vmatmul.mubr.f32.gmra.mrb[86].mxu1 %v607_v2 }
 0x207   :  { %v714_v5 = vpop.f32.mrb[96].mxu0 }
 0x208   :  { %v715_v6 = vadd.f32 %v2493_v4, %v714_v5  ;;  %v716_v7 = vpop.f32.mrb[97].mxu0 }
 0x20a   :  { %v2496_v26 = vadd.f32 %v2071_v8, %v715_v6 }
 0x20b   :  { %v719_v9 = vpop.f32.mrb[98].mxu0 }
 0x20c   :  { %v720_v27 = vadd.f32 %v2493_v4, %v719_v9  ;;  %v721_v10 = vpop.f32.mrb[99].mxu0  ;;  %1001 = vadd.xlane.f32.xlu0 %v2496_v26  ;;  %v1146_v13 = vmul.f32 %v2496_v26, %v2496_v26 }
 0x20e   :  { %v2500_v12 = vadd.f32 %v2072_v11, %v720_v27  ;;  %v2082_v11 = vld [vmem:[#allocation2 + $0x58] sm:$0xff] }
 0x20f   :  { %v724_v14 = vpop.f32.mrb[100].mxu0 }
 0x210   :  { %v725_v15 = vadd.f32 %v2493_v4, %v724_v14  ;;  %v726_v16 = vpop.f32.mrb[101].mxu0  ;;  %1194 = vadd.xlane.f32.xlu0 %v1146_v13  ;;  %v1147_v17 = vmul.f32 %v2500_v12, %v2500_v12 }
 0x211   :  { %v2083_v16 = vld [vmem:[#allocation2 + $0x60] sm:$0xff] }
 0x212   :  { %v2507_v19 = vadd.f32 %v2073_v18, %v725_v15  ;;  %1196 = vadd.xlane.f32.xlu1 %v1147_v17 }
 0x213   :  { %v729_v20 = vpop.f32.mrb[102].mxu0 }
 0x214   :  { %v730_v21 = vadd.f32 %v2493_v4, %v729_v20  ;;  %v731_v22 = vpop.f32.mrb[103].mxu0  ;;  %1003 = vadd.xlane.f32.xlu0 %v2500_v12  ;;  %v1148_v23 = vmul.f32 %v2507_v19, %v2507_v19 }
 0x216   :  { %1005 = vadd.xlane.f32.xlu1 %v2507_v19  ;;  %v2514_v28 = vadd.f32 %v2074_v25, %v730_v21  ;;  %v2084_v25 = vld [vmem:[#allocation2 + $0x68] sm:$0xff] }
 0x217   :  { %v734_v24 = vpop.f32.mrb[0].mxu1 }
 0x218   :  { %v735_v29 = vadd.f32 %v2493_v4, %v734_v24  ;;  %v736_v30 = vpop.f32.mrb[1].mxu1  ;;  %1198 = vadd.xlane.f32.xlu0 %v1148_v23  ;;  %v1149_v35 = vmul.f32 %v2514_v28, %v2514_v28 }
 0x21a   :  { %v2517_v31 = vadd.f32 %v2075_v0, %v735_v29  ;;  %1007 = vadd.xlane.f32.xlu1 %v2514_v28 }
 0x21b   :  { %v739_v32 = vpop.f32.mrb[2].mxu1 }
 0x21c   :  { %v740_v33 = vadd.f32 %v2493_v4, %v739_v32  ;;  %v741_v34 = vpop.f32.mrb[3].mxu1  ;;  %1009 = vadd.xlane.f32.xlu0 %v2517_v31  ;;  %v1150_v36 = vmul.f32 %v2517_v31, %v2517_v31  ;;  %v2085_v32 = vld [vmem:[#allocation2 + $0x70] sm:$0xff] }
 0x21e   :  { %1200 = vadd.xlane.f32.xlu1 %v1149_v35  ;;  %v2526_v39 = vadd.f32 %v2076_v38, %v740_v33 }
 0x21f   :  { %v744_v37 = vpop.f32.mrb[4].mxu1 }
 0x220   :  { %v745_v40 = vadd.f32 %v2493_v4, %v744_v37  ;;  %v746_v41 = vpop.f32.mrb[5].mxu1  ;;  %1202 = vadd.xlane.f32.xlu0 %v1150_v36  ;;  %v1151_v47 = vmul.f32 %v2526_v39, %v2526_v39 }
 0x221   :  { %v2086_v41 = vld [vmem:[#allocation2 + $0x78] sm:$0xff] }
 0x222   :  { %v2529_v43 = vadd.f32 %v2077_v42, %v745_v40  ;;  %1011 = vadd.xlane.f32.xlu1 %v2526_v39 }
 0x223   :  { %v749_v44 = vpop.f32.mrb[6].mxu1 }
 0x224   :  { %v750_v45 = vadd.f32 %v2493_v4, %v749_v44  ;;  %v751_v46 = vpop.f32.mrb[7].mxu1  ;;  %1013 = vadd.xlane.f32.xlu0 %v2529_v43  ;;  %v1152_v48 = vmul.f32 %v2529_v43, %v2529_v43 }
 0x225   :  { %v2087_v46 = vld [vmem:[#allocation2 + $0x80] sm:$0xff] }
 0x226   :  { %1204 = vadd.xlane.f32.xlu1 %v1151_v47  ;;  %v2538_v51 = vadd.f32 %v2078_v50, %v750_v45 }
 0x227   :  { %v754_v49 = vpop.f32.mrb[8].mxu1 }
 0x228   :  { %v755_v52 = vadd.f32 %v2493_v4, %v754_v49  ;;  %v756_v53 = vpop.f32.mrb[9].mxu1  ;;  %1206 = vadd.xlane.f32.xlu0 %v1152_v48  ;;  %v1153_v58 = vmul.f32 %v2538_v51, %v2538_v51 }
 0x22a   :  { %v2541_v55 = vadd.f32 %v2079_v54, %v755_v52  ;;  %1015 = vadd.xlane.f32.xlu1 %v2538_v51 }
 0x22b   :  { %v759_v56 = vpop.f32.mrb[10].mxu1 }
 0x22c   :  { %v760_v57 = vadd.f32 %v2493_v4, %v759_v56  ;;  %v761_v1 = vpop.f32.mrb[11].mxu1  ;;  %1017 = vadd.xlane.f32.xlu0 %v2541_v55  ;;  %v1154_v59 = vmul.f32 %v2541_v55, %v2541_v55  ;;  %v2088_v56 = vld [vmem:[#allocation2 + $0x88] sm:$0xff] }
 0x22e   :  { %1208 = vadd.xlane.f32.xlu1 %v1153_v58  ;;  %v2550_v62 = vadd.f32 %v2080_v61, %v760_v57 }
 0x22f   :  { %v764_v60 = vpop.f32.mrb[12].mxu1 }
 0x230   :  { %v765_v63 = vadd.f32 %v2493_v4, %v764_v60  ;;  %v766_v2 = vpop.f32.mrb[13].mxu1  ;;  %1210 = vadd.xlane.f32.xlu0 %v1154_v59  ;;  %v1155_v9 = vmul.f32 %v2550_v62, %v2550_v62  ;;  %v2089_v59 = vld [vmem:[#allocation2 + $0x90] sm:$0xff] }
 0x232   :  { %v2553_v5 = vadd.f32 %v2081_v3, %v765_v63  ;;  %1019 = vadd.xlane.f32.xlu1 %v2550_v62 }
 0x233   :  { %v769_v6 = vpop.f32.mrb[14].mxu1 }
 0x234   :  { %v770_v7 = vadd.f32 %v2493_v4, %v769_v6  ;;  %v771_v8 = vpop.f32.mrb[15].mxu1  ;;  %1021 = vadd.xlane.f32.xlu0 %v2553_v5  ;;  %v1156_v27 = vmul.f32 %v2553_v5, %v2553_v5 }
 0x235   :  { %v2090_v8 = vld [vmem:[#allocation2 + $0x98] sm:$0xff] }
 0x236   :  { %1212 = vadd.xlane.f32.xlu1 %v1155_v9  ;;  %v2562_v13 = vadd.f32 %v2082_v11, %v770_v7  ;;  %v2091_v11 = vld [vmem:[#allocation2 + $0xa0] sm:$0xff] }
 0x237   :  { %v774_v10 = vpop.f32.mrb[16].mxu1 }
 0x238   :  { %v775_v14 = vadd.f32 %v2493_v4, %v774_v10  ;;  %v776_v15 = vpop.f32.mrb[17].mxu1  ;;  %1214 = vadd.xlane.f32.xlu0 %v1156_v27  ;;  %v1157_v22 = vmul.f32 %v2562_v13, %v2562_v13 }
 0x23a   :  { %v2565_v17 = vadd.f32 %v2083_v16, %v775_v14  ;;  %1023 = vadd.xlane.f32.xlu1 %v2562_v13 }
 0x23b   :  { %v779_v18 = vpop.f32.mrb[18].mxu1 }
 0x23c   :  { %v780_v20 = vadd.f32 %v2493_v4, %v779_v18  ;;  %v781_v21 = vpop.f32.mrb[19].mxu1  ;;  %1025 = vadd.xlane.f32.xlu0 %v2565_v17  ;;  %v1158_v23 = vmul.f32 %v2565_v17, %v2565_v17 }
 0x23e   :  { %1216 = vadd.xlane.f32.xlu1 %v1157_v22  ;;  %v2574_v29 = vadd.f32 %v2084_v25, %v780_v20 }
 0x23f   :  { %v784_v24 = vpop.f32.mrb[20].mxu1 }
 0x240   :  { %v785_v30 = vadd.f32 %v2493_v4, %v784_v24  ;;  %v786_v0 = vpop.f32.mrb[21].mxu1  ;;  %1218 = vadd.xlane.f32.xlu0 %v1158_v23  ;;  %v1159_v37 = vmul.f32 %v2574_v29, %v2574_v29  ;;  %v2092_v23 = vld [vmem:[#allocation2 + $0xa8] sm:$0xff] }
 0x241   :  { %v2093_v0 = vld [vmem:[#allocation2 + $0xb0] sm:$0xff] }
 0x242   :  { %v2577_v33 = vadd.f32 %v2085_v32, %v785_v30  ;;  %1027 = vadd.xlane.f32.xlu1 %v2574_v29 }
 0x243   :  { %v789_v34 = vpop.f32.mrb[22].mxu1 }
 0x244   :  { %v790_v35 = vadd.f32 %v2493_v4, %v789_v34  ;;  %v791_v36 = vpop.f32.mrb[23].mxu1  ;;  %1029 = vadd.xlane.f32.xlu0 %v2577_v33  ;;  %v1160_v38 = vmul.f32 %v2577_v33, %v2577_v33 }
 0x246   :  { %1220 = vadd.xlane.f32.xlu1 %v1159_v37  ;;  %v2586_v42 = vadd.f32 %v2086_v41, %v790_v35  ;;  %v2094_v41 = vld [vmem:[#allocation2 + $0xb8] sm:$0xff] }
 0x247   :  { %v794_v40 = vpop.f32.mrb[24].mxu1 }
 0x248   :  { %v795_v44 = vadd.f32 %v2493_v4, %v794_v40  ;;  %v796_v45 = vpop.f32.mrb[25].mxu1  ;;  %1222 = vadd.xlane.f32.xlu0 %v1160_v38  ;;  %v1161_v52 = vmul.f32 %v2586_v42, %v2586_v42 }
 0x24a   :  { %v2589_v47 = vadd.f32 %v2087_v46, %v795_v44  ;;  %1031 = vadd.xlane.f32.xlu1 %v2586_v42 }
 0x24b   :  { %v799_v48 = vpop.f32.mrb[26].mxu1 }
 0x24c   :  { %v800_v49 = vadd.f32 %v2493_v4, %v799_v48  ;;  %v801_v50 = vpop.f32.mrb[27].mxu1  ;;  %1033 = vadd.xlane.f32.xlu0 %v2589_v47  ;;  %v1162_v53 = vmul.f32 %v2589_v47, %v2589_v47  ;;  %v2095_v48 = vld [vmem:[#allocation2 + $0xc0] sm:$0xff] }
 0x24e   :  { %1224 = vadd.xlane.f32.xlu1 %v1161_v52  ;;  %v2598_v57 = vadd.f32 %v2088_v56, %v800_v49 }
 0x24f   :  { %v804_v54 = vpop.f32.mrb[28].mxu1 }
 0x250   :  { %v805_v1 = vadd.f32 %v2493_v4, %v804_v54  ;;  %v806_v58 = vpop.f32.mrb[29].mxu1  ;;  %1226 = vadd.xlane.f32.xlu0 %v1162_v53  ;;  %v1163_v3 = vmul.f32 %v2598_v57, %v2598_v57 }
 0x251   :  { %v2096_v58 = vld [vmem:[#allocation2 + $0xc8] sm:$0xff] }
 0x252   :  { %v2601_v60 = vadd.f32 %v2089_v59, %v805_v1  ;;  %1035 = vadd.xlane.f32.xlu1 %v2598_v57 }
 0x253   :  { %v809_v61 = vpop.f32.mrb[30].mxu1 }
 0x254   :  { %v810_v63 = vadd.f32 %v2493_v4, %v809_v61  ;;  %v811_v2 = vpop.f32.mrb[31].mxu1  ;;  %1037 = vadd.xlane.f32.xlu0 %v2601_v60  ;;  %v1164_v6 = vmul.f32 %v2601_v60, %v2601_v60 }
 0x255   :  { %v2097_v2 = vld [vmem:[#allocation2 + $0xd0] sm:$0xff] }
 0x256   :  { %1228 = vadd.xlane.f32.xlu1 %v1163_v3  ;;  %v2610_v9 = vadd.f32 %v2090_v8, %v810_v63 }
 0x257   :  { %v814_v7 = vpop.f32.mrb[32].mxu1 }
 0x258   :  { %v815_v27 = vadd.f32 %v2493_v4, %v814_v7  ;;  %v816_v10 = vpop.f32.mrb[33].mxu1  ;;  %1230 = vadd.xlane.f32.xlu0 %v1164_v6  ;;  %v1165_v20 = vmul.f32 %v2610_v9, %v2610_v9 }
 0x25a   :  { %v2613_v14 = vadd.f32 %v2091_v11, %v815_v27  ;;  %1039 = vadd.xlane.f32.xlu1 %v2610_v9 }
 0x25b   :  { %v819_v15 = vpop.f32.mrb[34].mxu1 }
 0x25c   :  { %v820_v16 = vadd.f32 %v2493_v4, %v819_v15  ;;  %v821_v18 = vpop.f32.mrb[35].mxu1  ;;  %1041 = vadd.xlane.f32.xlu0 %v2613_v14  ;;  %v1166_v21 = vmul.f32 %v2613_v14, %v2613_v14  ;;  %v2098_v15 = vld [vmem:[#allocation2 + $0xd8] sm:$0xff] }
 0x25e   :  { %1232 = vadd.xlane.f32.xlu1 %v1165_v20  ;;  %v2622_v24 = vadd.f32 %v2092_v23, %v820_v16 }
 0x25f   :  { %v824_v22 = vpop.f32.mrb[36].mxu1 }
 0x260   :  { %v825_v25 = vadd.f32 %v2493_v4, %v824_v22  ;;  %v826_v30 = vpop.f32.mrb[37].mxu1  ;;  %1234 = vadd.xlane.f32.xlu0 %v1166_v21  ;;  %v1167_v37 = vmul.f32 %v2622_v24, %v2622_v24  ;;  %v2099_v21 = vld [vmem:[#allocation2 + $0xe0] sm:$0xff] }
 0x262   :  { %v2625_v32 = vadd.f32 %v2093_v0, %v825_v25  ;;  %1043 = vadd.xlane.f32.xlu1 %v2622_v24 }
 0x263   :  { %v829_v34 = vpop.f32.mrb[38].mxu1 }
 0x264   :  { %v830_v35 = vadd.f32 %v2493_v4, %v829_v34  ;;  %v831_v36 = vpop.f32.mrb[39].mxu1  ;;  %1045 = vadd.xlane.f32.xlu0 %v2625_v32  ;;  %v1168_v38 = vmul.f32 %v2625_v32, %v2625_v32 }
 0x265   :  { %v2100_v36 = vld [vmem:[#allocation2 + $0xe8] sm:$0xff] }
 0x266   :  { %1236 = vadd.xlane.f32.xlu1 %v1167_v37  ;;  %v2634_v44 = vadd.f32 %v2094_v41, %v830_v35  ;;  %v2101_v41 = vld [vmem:[#allocation2 + $0xf0] sm:$0xff] }
 0x267   :  { %v834_v40 = vpop.f32.mrb[40].mxu1 }
 0x268   :  { %v835_v45 = vadd.f32 %v2493_v4, %v834_v40  ;;  %v836_v46 = vpop.f32.mrb[41].mxu1  ;;  %1238 = vadd.xlane.f32.xlu0 %v1168_v38  ;;  %v1169_v54 = vmul.f32 %v2634_v44, %v2634_v44 }
 0x26a   :  { %v2637_v49 = vadd.f32 %v2095_v48, %v835_v45  ;;  %1047 = vadd.xlane.f32.xlu1 %v2634_v44 }
 0x26b   :  { %v839_v50 = vpop.f32.mrb[42].mxu1 }
 0x26c   :  { %v840_v52 = vadd.f32 %v2493_v4, %v839_v50  ;;  %v841_v53 = vpop.f32.mrb[43].mxu1  ;;  %1049 = vadd.xlane.f32.xlu0 %v2637_v49  ;;  %v1170_v56 = vmul.f32 %v2637_v49, %v2637_v49 }
 0x26e   :  { %1240 = vadd.xlane.f32.xlu1 %v1169_v54  ;;  %v2646_v59 = vadd.f32 %v2096_v58, %v840_v52 }
 0x26f   :  { %v844_v1 = vpop.f32.mrb[44].mxu1 }
 0x270   :  { %v845_v61 = vadd.f32 %v2493_v4, %v844_v1  ;;  %v846_v63 = vpop.f32.mrb[45].mxu1  ;;  %1242 = vadd.xlane.f32.xlu0 %v1170_v56  ;;  %v1171_v27 = vmul.f32 %v2646_v59, %v2646_v59  ;;  %v2102_v56 = vld [vmem:[#allocation2 + $0xf8] sm:$0xff] }
 0x271   :  { %v2103_v63 = vld [vmem:[#allocation2 + $0x100] sm:$0xff] }
 0x272   :  { %v2649_v3 = vadd.f32 %v2097_v2, %v845_v61  ;;  %1051 = vadd.xlane.f32.xlu1 %v2646_v59 }
 0x273   :  { %v849_v6 = vpop.f32.mrb[46].mxu1 }
 0x274   :  { %v850_v7 = vadd.f32 %v2493_v4, %v849_v6  ;;  %v851_v8 = vpop.f32.mrb[47].mxu1  ;;  %1053 = vadd.xlane.f32.xlu0 %v2649_v3  ;;  %v1172_v10 = vmul.f32 %v2649_v3, %v2649_v3 }
 0x276   :  { %1244 = vadd.xlane.f32.xlu1 %v1171_v27  ;;  %v2658_v16 = vadd.f32 %v2098_v15, %v850_v7  ;;  %v2104_v15 = vld [vmem:[#allocation2 + $0x108] sm:$0xff] }
 0x277   :  { %v854_v11 = vpop.f32.mrb[48].mxu1 }
 0x278   :  { %v855_v18 = vadd.f32 %v2493_v4, %v854_v11  ;;  %v856_v20 = vpop.f32.mrb[49].mxu1  ;;  %1246 = vadd.xlane.f32.xlu0 %v1172_v10  ;;  %v1173_v0 = vmul.f32 %v2658_v16, %v2658_v16 }
 0x27a   :  { %v2661_v22 = vadd.f32 %v2099_v21, %v855_v18  ;;  %1055 = vadd.xlane.f32.xlu1 %v2658_v16 }
 0x27b   :  { %v859_v23 = vpop.f32.mrb[50].mxu1 }
 0x27c   :  { %v860_v25 = vadd.f32 %v2493_v4, %v859_v23  ;;  %v861_v30 = vpop.f32.mrb[51].mxu1  ;;  %1057 = vadd.xlane.f32.xlu0 %v2661_v22  ;;  %v1174_v34 = vmul.f32 %v2661_v22, %v2661_v22  ;;  %v2105_v23 = vld [vmem:[#allocation2 + $0x110] sm:$0xff] }
 0x27e   :  { %1248 = vadd.xlane.f32.xlu1 %v1173_v0  ;;  %v2670_v37 = vadd.f32 %v2100_v36, %v860_v25 }
 0x27f   :  { %v864_v35 = vpop.f32.mrb[52].mxu1 }
 0x280   :  { %v865_v38 = vadd.f32 %v2493_v4, %v864_v35  ;;  %v866_v40 = vpop.f32.mrb[53].mxu1  ;;  %1250 = vadd.xlane.f32.xlu0 %v1174_v34  ;;  %v1175_v52 = vmul.f32 %v2670_v37, %v2670_v37 }
 0x281   :  { %v2106_v40 = vld [vmem:[#allocation2 + $0x118] sm:$0xff] }
 0x282   :  { %v2673_v45 = vadd.f32 %v2101_v41, %v865_v38  ;;  %1059 = vadd.xlane.f32.xlu1 %v2670_v37 }
 0x283   :  { %v869_v46 = vpop.f32.mrb[54].mxu1 }
 0x284   :  { %v870_v48 = vadd.f32 %v2493_v4, %v869_v46  ;;  %v871_v50 = vpop.f32.mrb[55].mxu1  ;;  %1061 = vadd.xlane.f32.xlu0 %v2673_v45  ;;  %v1176_v53 = vmul.f32 %v2673_v45, %v2673_v45 }
 0x286   :  { %1252 = vadd.xlane.f32.xlu1 %v1175_v52  ;;  %v2682_v1 = vadd.f32 %v2102_v56, %v870_v48  ;;  %v2107_v52 = vld [vmem:[#allocation2 + $0x120] sm:$0xff] }
 0x287   :  { %v874_v54 = vpop.f32.mrb[56].mxu1 }
 0x288   :  { %v875_v58 = vadd.f32 %v2493_v4, %v874_v54  ;;  %v876_v61 = vpop.f32.mrb[57].mxu1  ;;  %1254 = vadd.xlane.f32.xlu0 %v1176_v53  ;;  %v1177_v27 = vmul.f32 %v2682_v1, %v2682_v1 }
 0x28a   :  { %v2685_v2 = vadd.f32 %v2103_v63, %v875_v58  ;;  %1063 = vadd.xlane.f32.xlu1 %v2682_v1 }
 0x28b   :  { %v879_v6 = vpop.f32.mrb[58].mxu1 }
 0x28c   :  { %v880_v7 = vadd.f32 %v2493_v4, %v879_v6  ;;  %v881_v8 = vpop.f32.mrb[59].mxu1  ;;  %1065 = vadd.xlane.f32.xlu0 %v2685_v2  ;;  %v1178_v10 = vmul.f32 %v2685_v2, %v2685_v2 }
 0x28e   :  { %1256 = vadd.xlane.f32.xlu1 %v1177_v27  ;;  %v2694_v18 = vadd.f32 %v2104_v15, %v880_v7  ;;  %v2108_v15 = vld [vmem:[#allocation2 + $0x128] sm:$0xff] }
 0x28f   :  { %v884_v11 = vpop.f32.mrb[60].mxu1 }
 0x290   :  { %v885_v20 = vadd.f32 %v2493_v4, %v884_v11  ;;  %v886_v21 = vpop.f32.mrb[61].mxu1  ;;  %1258 = vadd.xlane.f32.xlu0 %v1178_v10  ;;  %v1179_v35 = vmul.f32 %v2694_v18, %v2694_v18 }
 0x292   :  { %v2697_v25 = vadd.f32 %v2105_v23, %v885_v20  ;;  %1067 = vadd.xlane.f32.xlu1 %v2694_v18 }
 0x293   :  { %v889_v30 = vpop.f32.mrb[62].mxu1 }
 0x294   :  { %v890_v0 = vadd.f32 %v2493_v4, %v889_v30  ;;  %v891_v34 = vpop.f32.mrb[63].mxu1  ;;  %1069 = vadd.xlane.f32.xlu0 %v2697_v25  ;;  %v1180_v36 = vmul.f32 %v2697_v25, %v2697_v25 }
 0x296   :  { %1260 = vadd.xlane.f32.xlu1 %v1179_v35  ;;  %v2706_v41 = vadd.f32 %v2106_v40, %v890_v0  ;;  %v2109_v35 = vld [vmem:[#allocation2 + $0x130] sm:$0xff] }
 0x297   :  { %v894_v38 = vpop.f32.mrb[64].mxu1 }
 0x298   :  { %v895_v46 = vadd.f32 %v2493_v4, %v894_v38  ;;  %v896_v48 = vpop.f32.mrb[65].mxu1  ;;  %1262 = vadd.xlane.f32.xlu0 %v1180_v36  ;;  %v1181_v63 = vmul.f32 %v2706_v41, %v2706_v41 }
 0x299   :  { %v1002_v50 = vpop.xlane.xlu0 %1001 }
 0x29a   :  { %v2709_v53 = vadd.f32 %v2107_v52, %v895_v46  ;;  %v2711_v54 = vmul.f32 0.0078125, %v1002_v50  ;;  %1071 = vadd.xlane.f32.xlu1 %v2706_v41 }
 0x29b   :  { %v899_v56 = vpop.f32.mrb[66].mxu1 }
 0x29c   :  { %3209 = vst [vmem:[#allocation12_spill] sm:$0xff] %v2709_v53  ;;  %v900_v58 = vadd.f32 %v2493_v4, %v899_v56  ;;  %v901_v61 = vpop.f32.mrb[67].mxu1  ;;  %1073 = vadd.xlane.f32.xlu0 %v2709_v53  ;;  %v1338_v7 = vmul.f32 %v2711_v54, %v2711_v54  ;;  %v1182_v27 = vmul.f32 %v2709_v53, %v2709_v53 }
 0x29d   :  { %v1195_v6 = vpop.xlane.xlu0 %1194 }
 0x29e   :  { %v1290_v8 = vmul.f32 0.0078125, %v1195_v6  ;;  %1264 = vadd.xlane.f32.xlu1 %v1181_v63  ;;  %v2722_v20 = vadd.f32 %v2108_v15, %v900_v58 }
 0x29f   :  { %v904_v10 = vpop.f32.mrb[68].mxu1  ;;  %v1197_v11 = vpop.xlane.xlu1 %1196 }
 0x2a0   :  { %3210 = vst [vmem:[#allocation13_spill] sm:$0xff] %v2722_v20  ;;  %v1386_v21 = vsub.f32 %v1290_v8, %v1338_v7  ;;  %v905_v23 = vadd.f32 %v2493_v4, %v904_v10  ;;  %v906_v30 = vpop.f32.mrb[69].mxu1  ;;  %1266 = vadd.xlane.f32.xlu0 %v1182_v27  ;;  %v1291_v40 = vmul.f32 0.0078125, %v1197_v11  ;;  %v1183_v61 = vmul.f32 %v2722_v20, %v2722_v20  ;;  %v2110_v10 = vld [vmem:[#allocation2 + $0x138] sm:$0xff] }
 0x2a1   :  { %v1004_v0 = vpop.xlane.xlu0 %1003 }
 0x2a2   :  { %v1434_v34 = vmax.f32 %v1386_v21, 0.0  ;;  %v2725_v36 = vadd.f32 %v2109_v35, %v905_v23  ;;  %v2727_v38 = vmul.f32 0.0078125, %v1004_v0  ;;  %1075 = vadd.xlane.f32.xlu1 %v2722_v20 }
 0x2a3   :  { %v909_v46 = vpop.f32.mrb[70].mxu1  ;;  %v1006_v48 = vpop.xlane.xlu1 %1005 }
 0x2a4   :  { %3211 = vst [vmem:[#allocation14_spill] sm:$0xff] %v2725_v36  ;;  %v1482_v50 = vadd.f32 1e-05, %v1434_v34  ;;  %v1339_v52 = vmul.f32 %v2727_v38, %v2727_v38  ;;  %v910_v56 = vadd.f32 %v2493_v4, %v909_v46  ;;  %v911_v58 = vpop.f32.mrb[71].mxu1  ;;  %1077 = vadd.xlane.f32.xlu0 %v2725_v36  ;;  %v2736_v63 = vmul.f32 0.0078125, %v1006_v48 }
 0x2a5   :  { %v1199_v6 = vpop.xlane.xlu0 %1198  ;;  %v1184_v27 = vmul.f32 %v2725_v36, %v2725_v36 }
 0x2a6   :  { %1975 = vrsqrt.f32 %v1482_v50  ;;  %v1387_v7 = vsub.f32 %v1291_v40, %v1339_v52  ;;  %v1292_v8 = vmul.f32 0.0078125, %v1199_v6  ;;  %1268 = vadd.xlane.f32.xlu1 %v1183_v61  ;;  %v2740_v11 = vadd.f32 %v2110_v10, %v910_v56  ;;  %v2111_v50 = vld [vmem:[#allocation2 + $0x140] sm:$0xff] }
 0x2a7   :  { %v1340_v15 = vmul.f32 %v2736_v63, %v2736_v63  ;;  %v914_v21 = vpop.f32.mrb[72].mxu1  ;;  %v1008_v23 = vpop.xlane.xlu1 %1007 }
 0x2a8   :  { %3212 = vst [vmem:[#allocation15_spill] sm:$0xff] %v2740_v11  ;;  %v1435_v30 = vmax.f32 %v1387_v7, 0.0  ;;  %v915_v0 = vadd.f32 %v2493_v4, %v914_v21  ;;  %v2745_v34 = vmul.f32 0.0078125, %v1008_v23  ;;  %v916_v35 = vpop.f32.mrb[73].mxu1  ;;  %1270 = vadd.xlane.f32.xlu0 %v1184_v27  ;;  %v1185_v7 = vmul.f32 %v2740_v11, %v2740_v11 }
 0x2a9   :  { %v1388_v40 = vsub.f32 %v1292_v8, %v1340_v15  ;;  %v1010_v46 = vpop.xlane.xlu0 %1009 }
 0x2aa   :  { %v1483_v48 = vadd.f32 1e-05, %v1435_v30  ;;  %v2747_v52 = vadd.f32 %v2111_v50, %v915_v0  ;;  %1079 = vadd.xlane.f32.xlu1 %v2740_v11  ;;  %v2750_v58 = vmul.f32 0.0078125, %v1010_v46  ;;  %v1341_v27 = vmul.f32 %v2745_v34, %v2745_v34  ;;  %v2113_v11 = vld [vmem:[#allocation2 + $0x150] sm:$0xff] }
 0x2ab   :  { %v1436_v56 = vmax.f32 %v1388_v40, 0.0  ;;  %v919_v61 = vpop.f32.mrb[74].mxu1  ;;  %v1201_v6 = vpop.xlane.xlu1 %1200  ;;  %v1578_v46 = vsub.f32 %v2496_v26, %v2711_v54 }
 0x2ac   :  { %3213 = vst [vmem:[#allocation16_spill] sm:$0xff] %v2747_v52  ;;  %1977 = vrsqrt.f32 %v1483_v48  ;;  %v920_v8 = vadd.f32 %v2493_v4, %v919_v61  ;;  %v1293_v10 = vmul.f32 0.0078125, %v1201_v6  ;;  %v921_v15 = vpop.f32.mrb[75].mxu1  ;;  %1081 = vadd.xlane.f32.xlu0 %v2747_v52  ;;  %v1342_v30 = vmul.f32 %v2750_v58, %v2750_v58  ;;  %v2112_v48 = vld [vmem:[#allocation2 + $0x148] sm:$0xff] }
 0x2ad   :  { %v1484_v21 = vadd.f32 1e-05, %v1436_v56  ;;  %v1203_v23 = vpop.xlane.xlu0 %1202  ;;  %v1186_v40 = vmul.f32 %v2747_v52, %v2747_v52  ;;  %v2769_v15 = vld [vmem:[%s3197_s5] ss:$0 sm:$0xff] }
 0x2ae   :  { %v1389_v0 = vsub.f32 %v1293_v10, %v1341_v27  ;;  %v1294_v35 = vmul.f32 0.0078125, %v1203_v23  ;;  %1272 = vadd.xlane.f32.xlu1 %v1185_v7  ;;  %v2764_v50 = vadd.f32 %v2112_v48, %v920_v8  ;;  %v2777_v8 = vld [vmem:[%s3198_s6] ss:$0 sm:$0xff] }
 0x2af   :  { %1979 = vrsqrt.f32 %v1484_v21  ;;  %v924_v61 = vpop.f32.mrb[76].mxu1  ;;  %v1012_v6 = vpop.xlane.xlu1 %1011 }
 0x2b0   :  { %3214 = vst [vmem:[#allocation17_spill] sm:$0xff] %v2764_v50  ;;  %v1976_v56 = vpop.eup %1975  ;;  %v1437_v27 = vmax.f32 %v1389_v0, 0.0  ;;  %v1390_v7 = vsub.f32 %v1294_v35, %v1342_v30  ;;  %v925_v10 = vadd.f32 %v2493_v4, %v924_v61  ;;  %v2772_v23 = vmul.f32 0.0078125, %v1012_v6  ;;  %v926_v52 = vpop.f32.mrb[77].mxu1  ;;  %1274 = vadd.xlane.f32.xlu0 %v1186_v40 }
 0x2b1   :  { %v1626_v26 = vmul.f32 %v1976_v56, %v1578_v46  ;;  %v1014_v54 = vpop.xlane.xlu0 %1013  ;;  %v1187_v46 = vmul.f32 %v2764_v50, %v2764_v50 }
 0x2b2   :  { %v1485_v21 = vadd.f32 1e-05, %v1437_v27  ;;  %v1438_v48 = vmax.f32 %v1390_v7, 0.0  ;;  %v2779_v36 = vadd.f32 %v2113_v11, %v925_v10  ;;  %1083 = vadd.xlane.f32.xlu1 %v2764_v50  ;;  %v1343_v52 = vmul.f32 %v2772_v23, %v2772_v23 }
 0x2b3   :  { %v1681_v30 = vmul.f32 %v2769_v15, %v1626_v26  ;;  %v2785_v0 = vmul.f32 0.0078125, %v1014_v54  ;;  %v929_v35 = vpop.f32.mrb[78].mxu1  ;;  %v1205_v40 = vpop.xlane.xlu1 %1204  ;;  %v1579_v7 = vsub.f32 %v2500_v12, %v2727_v38  ;;  %v1580_v12 = vsub.f32 %v2507_v19, %v2736_v63 }
 0x2b4   :  { %3215 = vst [vmem:[#allocation18_spill] sm:$0xff] %v2779_v36  ;;  %1981 = vrsqrt.f32 %v1485_v21  ;;  %v1486_v61 = vadd.f32 1e-05, %v1438_v48  ;;  %v930_v6 = vadd.f32 %v2493_v4, %v929_v35  ;;  %v1295_v11 = vmul.f32 0.0078125, %v1205_v40  ;;  %v931_v56 = vpop.f32.mrb[79].mxu1  ;;  %1085 = vadd.xlane.f32.xlu0 %v2779_v36  ;;  %v2114_v40 = vld [vmem:[#allocation2 + $0x158] sm:$0xff] }
 0x2b5   :  { %v1736_v27 = vadd.f32 %v2777_v8, %v1681_v30  ;;  %v1344_v10 = vmul.f32 %v2785_v0, %v2785_v0  ;;  %v1207_v26 = vpop.xlane.xlu0 %1206  ;;  %v1188_v48 = vmul.f32 %v2779_v36, %v2779_v36  ;;  %v1581_v63 = vsub.f32 %v2514_v28, %v2745_v34 }
 0x2b6   :  { %v1978_v54 = vpop.eup %1977  ;;  %1983 = vrsqrt.f32 %v1486_v61  ;;  %v1391_v50 = vsub.f32 %v1295_v11, %v1343_v52  ;;  %v1296_v21 = vmul.f32 0.0078125, %v1207_v26  ;;  %1276 = vadd.xlane.f32.xlu1 %v1187_v46  ;;  %v2798_v56 = vadd.f32 %v2114_v40, %v930_v6  ;;  %v2115_v40 = vld [vmem:[#allocation2 + $0x160] sm:$0xff] }
 0x2b7   :  { %1784 = vst [vmem:[#allocation8] sm:$0xff] %v1736_v27  ;;  %v1627_v35 = vmul.f32 %v1978_v54, %v1579_v7  ;;  %v934_v30 = vpop.f32.mrb[80].mxu1  ;;  %v1016_v20 = vpop.xlane.xlu1 %1015 }
 0x2b8   :  { %3216 = vst [vmem:[#allocation19_spill] sm:$0xff] %v2798_v56  ;;  %v1439_v38 = vmax.f32 %v1391_v50, 0.0  ;;  %v1392_v53 = vsub.f32 %v1296_v21, %v1344_v10  ;;  %v935_v61 = vadd.f32 %v2493_v4, %v934_v30  ;;  %v936_v52 = vpop.f32.mrb[81].mxu1  ;;  %1278 = vadd.xlane.f32.xlu0 %v1188_v48  ;;  %v2804_v26 = vmul.f32 0.0078125, %v1016_v20 }
 0x2b9   :  { %v1980_v46 = vpop.eup %1979  ;;  %v1682_v11 = vmul.f32 %v2769_v15, %v1627_v35  ;;  %v1018_v27 = vpop.xlane.xlu0 %1017  ;;  %v1189_v20 = vmul.f32 %v2798_v56, %v2798_v56 }
 0x2ba   :  { %v1628_v7 = vmul.f32 %v1980_v46, %v1580_v12  ;;  %v1487_v6 = vadd.f32 1e-05, %v1439_v38  ;;  %v1440_v54 = vmax.f32 %v1392_v53, 0.0  ;;  %v2806_v36 = vadd.f32 %v2115_v40, %v935_v61  ;;  %1087 = vadd.xlane.f32.xlu1 %v2798_v56 }
 0x2bb   :  { %v1737_v19 = vadd.f32 %v2777_v8, %v1682_v11  ;;  %v2812_v50 = vmul.f32 0.0078125, %v1018_v27  ;;  %v939_v10 = vpop.f32.mrb[82].mxu1  ;;  %v1209_v21 = vpop.xlane.xlu1 %1208  ;;  %v1345_v28 = vmul.f32 %v2804_v26, %v2804_v26  ;;  %v2116_v11 = vld [vmem:[#allocation2 + $0x168] sm:$0xff] }
 0x2bc   :  { %3217 = vst [vmem:[#allocation20_spill] sm:$0xff] %v2806_v36  ;;  %v1683_v48 = vmul.f32 %v2769_v15, %v1628_v7  ;;  %1985 = vrsqrt.f32 %v1487_v6  ;;  %v1488_v53 = vadd.f32 1e-05, %v1440_v54  ;;  %v940_v35 = vadd.f32 %v2493_v4, %v939_v10  ;;  %v941_v30 = vpop.f32.mrb[83].mxu1  ;;  %1089 = vadd.xlane.f32.xlu0 %v2806_v36 }
 0x2bd   :  { %1785 = vst [vmem:[#allocation8 + $0x8] sm:$0xff] %v1737_v19  ;;  %v1346_v34 = vmul.f32 %v2812_v50, %v2812_v50  ;;  %v1297_v12 = vmul.f32 0.0078125, %v1209_v21  ;;  %v1211_v38 = vpop.xlane.xlu0 %1210  ;;  %v1190_v61 = vmul.f32 %v2806_v36, %v2806_v36  ;;  %v1582_v6 = vsub.f32 %v2517_v31, %v2750_v58  ;;  %v2117_v31 = vld [vmem:[#allocation2 + $0x170] sm:$0xff] }
 0x2be   :  { %v1982_v52 = vpop.eup %1981  ;;  %v1738_v46 = vadd.f32 %v2777_v8, %v1683_v48  ;;  %1987 = vrsqrt.f32 %v1488_v53  ;;  %v2826_v27 = vadd.f32 %v2116_v11, %v940_v35  ;;  %v1298_v7 = vmul.f32 0.0078125, %v1211_v38  ;;  %1280 = vadd.xlane.f32.xlu1 %v1189_v20 }
 0x2bf   :  { %v1629_v54 = vmul.f32 %v1982_v52, %v1581_v63  ;;  %v1393_v40 = vsub.f32 %v1297_v12, %v1345_v28  ;;  %v944_v19 = vpop.f32.mrb[84].mxu1  ;;  %v1020_v10 = vpop.xlane.xlu1 %1019 }
 0x2c0   :  { %v1984_v21 = vpop.eup %1983  ;;  %1786 = vst [vmem:[#allocation8 + $0x10] sm:$0xff] %v1738_v46  ;;  %v1394_v30 = vsub.f32 %v1298_v7, %v1346_v34  ;;  %v945_v36 = vadd.f32 %v2493_v4, %v944_v19  ;;  %v2831_v56 = vmul.f32 0.0078125, %v1020_v10  ;;  %v946_v48 = vpop.f32.mrb[85].mxu1  ;;  %1282 = vadd.xlane.f32.xlu0 %v1190_v61  ;;  %v1191_v63 = vmul.f32 %v2826_v27, %v2826_v27 }
 0x2c1   :  { %v1684_v53 = vmul.f32 %v2769_v15, %v1629_v54  ;;  %v1630_v35 = vmul.f32 %v1984_v21, %v1582_v6  ;;  %v1441_v20 = vmax.f32 %v1393_v40, 0.0  ;;  %v1022_v38 = vpop.xlane.xlu0 %1021  ;;  %v1583_v10 = vsub.f32 %v2526_v39, %v2772_v23 }
 0x2c2   :  { %v1442_v11 = vmax.f32 %v1394_v30, 0.0  ;;  %v2834_v58 = vadd.f32 %v2117_v31, %v945_v36  ;;  %1091 = vadd.xlane.f32.xlu1 %v2826_v27  ;;  %v2841_v61 = vmul.f32 0.0078125, %v1022_v38  ;;  %v1347_v6 = vmul.f32 %v2831_v56, %v2831_v56 }
 0x2c3   :  { %v1739_v28 = vadd.f32 %v2777_v8, %v1684_v53  ;;  %v1685_v34 = vmul.f32 %v2769_v15, %v1630_v35  ;;  %v1489_v12 = vadd.f32 1e-05, %v1441_v20  ;;  %v949_v52 = vpop.f32.mrb[86].mxu1  ;;  %v1213_v46 = vpop.xlane.xlu1 %1212  ;;  %v1584_v20 = vsub.f32 %v2529_v43, %v2785_v0 }
 0x2c4   :  { %v1490_v7 = vadd.f32 1e-05, %v1442_v11  ;;  %v950_v36 = vadd.f32 %v2493_v4, %v949_v52  ;;  %v1299_v54 = vmul.f32 0.0078125, %v1213_v46  ;;  %v951_v40 = vpop.f32.mrb[87].mxu1  ;;  %1093 = vadd.xlane.f32.xlu0 %v2834_v58  ;;  %v1192_v30 = vmul.f32 %v2834_v58, %v2834_v58  ;;  %v2118_v11 = vld [vmem:[#allocation2 + $0x178] sm:$0xff] }
 0x2c5   :  { %1787 = vst [vmem:[#allocation8 + $0x18] sm:$0xff] %v1739_v28  ;;  %v1740_v19 = vadd.f32 %v2777_v8, %v1685_v34  ;;  %1989 = vrsqrt.f32 %v1489_v12  ;;  %v1215_v21 = vpop.xlane.xlu0 %1214  ;;  %v1348_v4 = vmul.f32 %v2841_v61, %v2841_v61 }
 0x2c6   :  { %v1986_v48 = vpop.eup %1985  ;;  %1991 = vrsqrt.f32 %v1490_v7  ;;  %v1395_v53 = vsub.f32 %v1299_v54, %v1347_v6  ;;  %v1300_v35 = vmul.f32 0.0078125, %v1215_v21  ;;  %1284 = vadd.xlane.f32.xlu1 %v1191_v63  ;;  %v2856_v39 = vadd.f32 %v2118_v11, %v950_v36 }
 0x2c7   :  { %1788 = vst [vmem:[#allocation8 + $0x20] sm:$0xff] %v1740_v19  ;;  %v1631_v38 = vmul.f32 %v1986_v48, %v1583_v10  ;;  %v1024_v23 = vpop.xlane.xlu1 %1023  ;;  %v1585_v48 = vsub.f32 %v2538_v51, %v2804_v26  ;;  %v1586_v11 = vsub.f32 %v2541_v55, %v2812_v50 }
 0x2c8   :  { %v1988_v31 = vpop.eup %1987  ;;  %v1443_v28 = vmax.f32 %v1395_v53, 0.0  ;;  %v1396_v34 = vsub.f32 %v1300_v35, %v1348_v4  ;;  %v2858_v12 = vmul.f32 0.0078125, %v1024_v23  ;;  %1286 = vadd.xlane.f32.xlu0 %v1192_v30  ;;  %v1193_v40 = vmul.f32 %v2856_v39, %v2856_v39 }
 0x2c9   :  { %v1686_v52 = vmul.f32 %v2769_v15, %v1631_v38  ;;  %v1632_v46 = vmul.f32 %v1988_v31, %v1584_v20  ;;  %v1026_v7 = vpop.xlane.xlu0 %1025 }
 0x2ca   :  { %v1491_v63 = vadd.f32 1e-05, %v1443_v28  ;;  %v1444_v6 = vmax.f32 %v1396_v34, 0.0  ;;  %1095 = vadd.xlane.f32.xlu1 %v2856_v39  ;;  %v2864_v36 = vmul.f32 0.0078125, %v1026_v7  ;;  %v1349_v10 = vmul.f32 %v2858_v12, %v2858_v12 }
 0x2cb   :  { %v1741_v43 = vadd.f32 %v2777_v8, %v1686_v52  ;;  %v1687_v0 = vmul.f32 %v2769_v15, %v1632_v46  ;;  %v1217_v54 = vpop.xlane.xlu1 %1216 }
 0x2cc   :  { %1993 = vrsqrt.f32 %v1491_v63  ;;  %v1492_v19 = vadd.f32 1e-05, %v1444_v6  ;;  %v1301_v21 = vmul.f32 0.0078125, %v1217_v54  ;;  %v1350_v53 = vmul.f32 %v2864_v36, %v2864_v36 }
 0x2cd   :  { %1789 = vst [vmem:[#allocation8 + $0x28] sm:$0xff] %v1741_v43  ;;  %v1742_v30 = vadd.f32 %v2777_v8, %v1687_v0  ;;  %v1219_v4 = vpop.xlane.xlu0 %1218 }
 0x2ce   :  { %1995 = vrsqrt.f32 %v1492_v19  ;;  %v1397_v35 = vsub.f32 %v1301_v21, %v1349_v10  ;;  %v1302_v20 = vmul.f32 0.0078125, %v1219_v4  ;;  %1288 = vadd.xlane.f32.xlu1 %v1193_v40  ;;  %v1587_v21 = vsub.f32 %v2550_v62, %v2831_v56 }
 0x2cf   :  { %v1990_v38 = vpop.eup %1989  ;;  %1790 = vst [vmem:[#allocation8 + $0x30] sm:$0xff] %v1742_v30  ;;  %v1028_v23 = vpop.xlane.xlu1 %1027 }
 0x2d0   :  { %v1992_v31 = vpop.eup %1991  ;;  %v1633_v28 = vmul.f32 %v1990_v38, %v1585_v48  ;;  %v1445_v34 = vmax.f32 %v1397_v35, 0.0  ;;  %v1398_v52 = vsub.f32 %v1302_v20, %v1350_v53  ;;  %v2877_v46 = vmul.f32 0.0078125, %v1028_v23 }
 0x2d1   :  { %v1634_v51 = vmul.f32 %v1992_v31, %v1586_v11  ;;  %v1030_v26 = vpop.xlane.xlu0 %1029  ;;  %v1588_v20 = vsub.f32 %v2553_v5, %v2841_v61 }
 0x2d2   :  { %v1688_v7 = vmul.f32 %v2769_v15, %v1633_v28  ;;  %v1493_v63 = vadd.f32 1e-05, %v1445_v34  ;;  %v1446_v6 = vmax.f32 %v1398_v52, 0.0  ;;  %v1351_v0 = vmul.f32 %v2877_v46, %v2877_v46 }
 0x2d3   :  { %v1689_v43 = vmul.f32 %v2769_v15, %v1634_v51  ;;  %v2883_v54 = vmul.f32 0.0078125, %v1030_v26  ;;  %v1221_v55 = vpop.xlane.xlu1 %1220 }
 0x2d4   :  { %v1743_v50 = vadd.f32 %v2777_v8, %v1688_v7  ;;  %1997 = vrsqrt.f32 %v1493_v63  ;;  %v1494_v40 = vadd.f32 1e-05, %v1446_v6  ;;  %v1303_v19 = vmul.f32 0.0078125, %v1221_v55 }
 0x2d5   :  { %v1744_v10 = vadd.f32 %v2777_v8, %v1689_v43  ;;  %v1223_v30 = vpop.xlane.xlu0 %1222  ;;  %v1352_v4 = vmul.f32 %v2883_v54, %v2883_v54 }
 0x2d6   :  { %v1994_v48 = vpop.eup %1993  ;;  %1791 = vst [vmem:[#allocation8 + $0x38] sm:$0xff] %v1743_v50  ;;  %1999 = vrsqrt.f32 %v1494_v40  ;;  %v1399_v53 = vsub.f32 %v1303_v19, %v1351_v0  ;;  %v1304_v35 = vmul.f32 0.0078125, %v1223_v30  ;;  %v1589_v50 = vsub.f32 %v2562_v13, %v2858_v12 }
 0x2d7   :  { %1792 = vst [vmem:[#allocation8 + $0x40] sm:$0xff] %v1744_v10  ;;  %v1635_v38 = vmul.f32 %v1994_v48, %v1587_v21  ;;  %v1032_v11 = vpop.xlane.xlu1 %1031  ;;  %v1590_v48 = vsub.f32 %v2565_v17, %v2864_v36 }
 0x2d8   :  { %v1996_v23 = vpop.eup %1995  ;;  %v1447_v31 = vmax.f32 %v1399_v53, 0.0  ;;  %v1400_v28 = vsub.f32 %v1304_v35, %v1352_v4  ;;  %v2893_v34 = vmul.f32 0.0078125, %v1032_v11 }
 0x2d9   :  { %v1690_v62 = vmul.f32 %v2769_v15, %v1635_v38  ;;  %v1636_v56 = vmul.f32 %v1996_v23, %v1588_v20  ;;  %v1034_v52 = vpop.xlane.xlu0 %1033 }
 0x2da   :  { %v1495_v51 = vadd.f32 1e-05, %v1447_v31  ;;  %v1448_v26 = vmax.f32 %v1400_v28, 0.0  ;;  %v2898_v6 = vmul.f32 0.0078125, %v1034_v52  ;;  %v1353_v43 = vmul.f32 %v2893_v34, %v2893_v34 }
 0x2db   :  { %v1745_v7 = vadd.f32 %v2777_v8, %v1690_v62  ;;  %v1691_v63 = vmul.f32 %v2769_v15, %v1636_v56  ;;  %v1225_v5 = vpop.xlane.xlu1 %1224 }
 0x2dc   :  { %2001 = vrsqrt.f32 %v1495_v51  ;;  %v1496_v61 = vadd.f32 1e-05, %v1448_v26  ;;  %v1305_v0 = vmul.f32 0.0078125, %v1225_v5  ;;  %v1354_v10 = vmul.f32 %v2898_v6, %v2898_v6 }
 0x2dd   :  { %1793 = vst [vmem:[#allocation8 + $0x48] sm:$0xff] %v1745_v7  ;;  %v1746_v55 = vadd.f32 %v2777_v8, %v1691_v63  ;;  %v1227_v40 = vpop.xlane.xlu0 %1226  ;;  %v1591_v63 = vsub.f32 %v2574_v29, %v2877_v46 }
 0x2de   :  { %v1998_v19 = vpop.eup %1997  ;;  %2003 = vrsqrt.f32 %v1496_v61  ;;  %v1401_v21 = vsub.f32 %v1305_v0, %v1353_v43  ;;  %v1306_v30 = vmul.f32 0.0078125, %v1227_v40 }
 0x2df   :  { %1794 = vst [vmem:[#allocation8 + $0x50] sm:$0xff] %v1746_v55  ;;  %v1637_v4 = vmul.f32 %v1998_v19, %v1589_v50  ;;  %v1036_v53 = vpop.xlane.xlu1 %1035  ;;  %v1592_v50 = vsub.f32 %v2577_v33, %v2883_v54 }
 0x2e0   :  { %v2000_v35 = vpop.eup %1999  ;;  %v1449_v20 = vmax.f32 %v1401_v21, 0.0  ;;  %v1402_v38 = vsub.f32 %v1306_v30, %v1354_v10  ;;  %v2909_v11 = vmul.f32 0.0078125, %v1036_v53 }
 0x2e1   :  { %v1692_v13 = vmul.f32 %v2769_v15, %v1637_v4  ;;  %v1638_v12 = vmul.f32 %v2000_v35, %v1590_v48  ;;  %v1038_v23 = vpop.xlane.xlu0 %1037 }
 0x2e2   :  { %v1497_v31 = vadd.f32 1e-05, %v1449_v20  ;;  %v1450_v28 = vmax.f32 %v1402_v38, 0.0  ;;  %v2914_v52 = vmul.f32 0.0078125, %v1038_v23  ;;  %v1355_v51 = vmul.f32 %v2909_v11, %v2909_v11 }
 0x2e3   :  { %v1747_v62 = vadd.f32 %v2777_v8, %v1692_v13  ;;  %v1693_v56 = vmul.f32 %v2769_v15, %v1638_v12  ;;  %v1229_v17 = vpop.xlane.xlu1 %1228 }
 0x2e4   :  { %2005 = vrsqrt.f32 %v1497_v31  ;;  %v1498_v36 = vadd.f32 1e-05, %v1450_v28  ;;  %v1307_v26 = vmul.f32 0.0078125, %v1229_v17  ;;  %v1356_v43 = vmul.f32 %v2914_v52, %v2914_v52 }
 0x2e5   :  { %1795 = vst [vmem:[#allocation8 + $0x58] sm:$0xff] %v1747_v62  ;;  %v1748_v7 = vadd.f32 %v2777_v8, %v1693_v56  ;;  %v1231_v5 = vpop.xlane.xlu0 %1230  ;;  %v1593_v28 = vsub.f32 %v2586_v42, %v2893_v34 }
 0x2e6   :  { %v2002_v61 = vpop.eup %2001  ;;  %2007 = vrsqrt.f32 %v1498_v36  ;;  %v1403_v0 = vsub.f32 %v1307_v26, %v1355_v51  ;;  %v1308_v55 = vmul.f32 0.0078125, %v1231_v5  ;;  %v1594_v26 = vsub.f32 %v2589_v47, %v2898_v6 }
 0x2e7   :  { %1796 = vst [vmem:[#allocation8 + $0x60] sm:$0xff] %v1748_v7  ;;  %v1639_v40 = vmul.f32 %v2002_v61, %v1591_v63  ;;  %v1040_v19 = vpop.xlane.xlu1 %1039 }
 0x2e8   :  { %v2004_v10 = vpop.eup %2003  ;;  %v1451_v21 = vmax.f32 %v1403_v0, 0.0  ;;  %v1404_v30 = vsub.f32 %v1308_v55, %v1356_v43  ;;  %v2925_v48 = vmul.f32 0.0078125, %v1040_v19 }
 0x2e9   :  { %v1694_v29 = vmul.f32 %v2769_v15, %v1639_v40  ;;  %v1640_v46 = vmul.f32 %v2004_v10, %v1592_v50  ;;  %v1042_v4 = vpop.xlane.xlu0 %1041 }
 0x2ea   :  { %v1499_v53 = vadd.f32 1e-05, %v1451_v21  ;;  %v1452_v35 = vmax.f32 %v1404_v30, 0.0  ;;  %v2930_v13 = vmul.f32 0.0078125, %v1042_v4  ;;  %v1357_v12 = vmul.f32 %v2925_v48, %v2925_v48 }
 0x2eb   :  { %v1749_v20 = vadd.f32 %v2777_v8, %v1694_v29  ;;  %v1695_v38 = vmul.f32 %v2769_v15, %v1640_v46  ;;  %v1233_v33 = vpop.xlane.xlu1 %1232  ;;  %v1595_v4 = vsub.f32 %v2598_v57, %v2909_v11 }
 0x2ec   :  { %2009 = vrsqrt.f32 %v1499_v53  ;;  %v1500_v54 = vadd.f32 1e-05, %v1452_v35  ;;  %v1309_v23 = vmul.f32 0.0078125, %v1233_v33  ;;  %v1358_v17 = vmul.f32 %v2930_v13, %v2930_v13 }
 0x2ed   :  { %1797 = vst [vmem:[#allocation8 + $0x68] sm:$0xff] %v1749_v20  ;;  %v1750_v31 = vadd.f32 %v2777_v8, %v1695_v38  ;;  %v1235_v62 = vpop.xlane.xlu0 %1234 }
 0x2ee   :  { %v2006_v56 = vpop.eup %2005  ;;  %2011 = vrsqrt.f32 %v1500_v54  ;;  %v1405_v36 = vsub.f32 %v1309_v23, %v1357_v12  ;;  %v1310_v51 = vmul.f32 0.0078125, %v1235_v62  ;;  %v1596_v54 = vsub.f32 %v2601_v60, %v2914_v52 }
 0x2ef   :  { %1798 = vst [vmem:[#allocation8 + $0x70] sm:$0xff] %v1750_v31  ;;  %v1641_v7 = vmul.f32 %v2006_v56, %v1593_v28  ;;  %v1044_v63 = vpop.xlane.xlu1 %1043 }
 0x2f0   :  { %v2008_v5 = vpop.eup %2007  ;;  %v1453_v61 = vmax.f32 %v1405_v36, 0.0  ;;  %v1406_v43 = vsub.f32 %v1310_v51, %v1358_v17  ;;  %v2941_v0 = vmul.f32 0.0078125, %v1044_v63 }
 0x2f1   :  { %v1696_v42 = vmul.f32 %v2769_v15, %v1641_v7  ;;  %v1642_v34 = vmul.f32 %v2008_v5, %v1594_v26  ;;  %v1046_v55 = vpop.xlane.xlu0 %1045 }
 0x2f2   :  { %v1501_v50 = vadd.f32 1e-05, %v1453_v61  ;;  %v1454_v40 = vmax.f32 %v1406_v43, 0.0  ;;  %v2946_v21 = vmul.f32 0.0078125, %v1046_v55  ;;  %v1359_v30 = vmul.f32 %v2941_v0, %v2941_v0 }
 0x2f3   :  { %v1751_v19 = vadd.f32 %v2777_v8, %v1696_v42  ;;  %v1697_v10 = vmul.f32 %v2769_v15, %v1642_v34  ;;  %v1237_v47 = vpop.xlane.xlu1 %1236  ;;  %v1597_v42 = vsub.f32 %v2610_v9, %v2925_v48 }
 0x2f4   :  { %2013 = vrsqrt.f32 %v1501_v50  ;;  %v1502_v6 = vadd.f32 1e-05, %v1454_v40  ;;  %v1311_v29 = vmul.f32 0.0078125, %v1237_v47  ;;  %v1360_v20 = vmul.f32 %v2946_v21, %v2946_v21 }
 0x2f5   :  { %1799 = vst [vmem:[#allocation8 + $0x78] sm:$0xff] %v1751_v19  ;;  %v1752_v46 = vadd.f32 %v2777_v8, %v1697_v10  ;;  %v1239_v53 = vpop.xlane.xlu0 %1238  ;;  %v1598_v10 = vsub.f32 %v2613_v14, %v2930_v13 }
 0x2f6   :  { %v2010_v35 = vpop.eup %2009  ;;  %2015 = vrsqrt.f32 %v1502_v6  ;;  %v1407_v38 = vsub.f32 %v1311_v29, %v1359_v30  ;;  %v1312_v33 = vmul.f32 0.0078125, %v1239_v53 }
 0x2f7   :  { %1800 = vst [vmem:[#allocation8 + $0x80] sm:$0xff] %v1752_v46  ;;  %v1643_v12 = vmul.f32 %v2010_v35, %v1595_v4  ;;  %v1048_v23 = vpop.xlane.xlu1 %1047 }
 0x2f8   :  { %v2012_v31 = vpop.eup %2011  ;;  %v1455_v28 = vmax.f32 %v1407_v38, 0.0  ;;  %v1408_v62 = vsub.f32 %v1312_v33, %v1360_v20  ;;  %v2957_v56 = vmul.f32 0.0078125, %v1048_v23 }
 0x2f9   :  { %v1698_v57 = vmul.f32 %v2769_v15, %v1643_v12  ;;  %v1644_v11 = vmul.f32 %v2012_v31, %v1596_v54  ;;  %v1050_v17 = vpop.xlane.xlu0 %1049 }
 0x2fa   :  { %v1503_v36 = vadd.f32 1e-05, %v1455_v28  ;;  %v1456_v51 = vmax.f32 %v1408_v62, 0.0  ;;  %v2962_v63 = vmul.f32 0.0078125, %v1050_v17  ;;  %v1361_v5 = vmul.f32 %v2957_v56, %v2957_v56 }
 0x2fb   :  { %v1753_v26 = vadd.f32 %v2777_v8, %v1698_v57  ;;  %v1699_v7 = vmul.f32 %v2769_v15, %v1644_v11  ;;  %v1241_v60 = vpop.xlane.xlu1 %1240  ;;  %v1599_v28 = vsub.f32 %v2622_v24, %v2941_v0 }
 0x2fc   :  { %2017 = vrsqrt.f32 %v1503_v36  ;;  %v1504_v52 = vadd.f32 1e-05, %v1456_v51  ;;  %v1313_v61 = vmul.f32 0.0078125, %v1241_v60  ;;  %v1362_v50 = vmul.f32 %v2962_v63, %v2962_v63 }
 0x2fd   :  { %1801 = vst [vmem:[#allocation8 + $0x88] sm:$0xff] %v1753_v26  ;;  %v1754_v43 = vadd.f32 %v2777_v8, %v1699_v7  ;;  %v1243_v34 = vpop.xlane.xlu0 %1242  ;;  %v1600_v51 = vsub.f32 %v2625_v32, %v2946_v21 }
 0x2fe   :  { %v2014_v55 = vpop.eup %2013  ;;  %2019 = vrsqrt.f32 %v1504_v52  ;;  %v1409_v40 = vsub.f32 %v1313_v61, %v1361_v5  ;;  %v1314_v19 = vmul.f32 0.0078125, %v1243_v34 }
 0x2ff   :  { %1802 = vst [vmem:[#allocation8 + $0x90] sm:$0xff] %v1754_v43  ;;  %v1645_v47 = vmul.f32 %v2014_v55, %v1597_v42  ;;  %v1052_v6 = vpop.xlane.xlu1 %1051 }
 0x300   :  { %v2016_v30 = vpop.eup %2015  ;;  %v1457_v29 = vmax.f32 %v1409_v40, 0.0  ;;  %v1410_v46 = vsub.f32 %v1314_v19, %v1362_v50  ;;  %v2973_v4 = vmul.f32 0.0078125, %v1052_v6  ;;  %v1601_v6 = vsub.f32 %v2634_v44, %v2957_v56 }
 0x301   :  { %v1700_v9 = vmul.f32 %v2769_v15, %v1645_v47  ;;  %v1646_v48 = vmul.f32 %v2016_v30, %v1598_v10  ;;  %v1054_v53 = vpop.xlane.xlu0 %1053 }
 0x302   :  { %v1505_v35 = vadd.f32 1e-05, %v1457_v29  ;;  %v1458_v20 = vmax.f32 %v1410_v46, 0.0  ;;  %v2978_v54 = vmul.f32 0.0078125, %v1054_v53  ;;  %v1363_v12 = vmul.f32 %v2973_v4, %v2973_v4 }
 0x303   :  { %v1755_v38 = vadd.f32 %v2777_v8, %v1700_v9  ;;  %v1701_v33 = vmul.f32 %v2769_v15, %v1646_v48  ;;  %v1245_v14 = vpop.xlane.xlu1 %1244  ;;  %v1602_v53 = vsub.f32 %v2637_v49, %v2962_v63 }
 0x304   :  { %2021 = vrsqrt.f32 %v1505_v35  ;;  %v1506_v13 = vadd.f32 1e-05, %v1458_v20  ;;  %v1315_v23 = vmul.f32 0.0078125, %v1245_v14  ;;  %v1364_v11 = vmul.f32 %v2978_v54, %v2978_v54 }
 0x305   :  { %1803 = vst [vmem:[#allocation8 + $0x98] sm:$0xff] %v1755_v38  ;;  %v1756_v31 = vadd.f32 %v2777_v8, %v1701_v33  ;;  %v1247_v62 = vpop.xlane.xlu0 %1246 }
 0x306   :  { %v2018_v57 = vpop.eup %2017  ;;  %2023 = vrsqrt.f32 %v1506_v13  ;;  %v1411_v17 = vsub.f32 %v1315_v23, %v1363_v12  ;;  %v1316_v36 = vmul.f32 0.0078125, %v1247_v62 }
 0x307   :  { %1804 = vst [vmem:[#allocation8 + $0xa0] sm:$0xff] %v1756_v31  ;;  %v1647_v26 = vmul.f32 %v2018_v57, %v1599_v28  ;;  %v1056_v7 = vpop.xlane.xlu1 %1055 }
 0x308   :  { %v2020_v60 = vpop.eup %2019  ;;  %v1459_v52 = vmax.f32 %v1411_v17, 0.0  ;;  %v1412_v5 = vsub.f32 %v1316_v36, %v1364_v11  ;;  %v2989_v61 = vmul.f32 0.0078125, %v1056_v7 }
 0x309   :  { %v1702_v24 = vmul.f32 %v2769_v15, %v1647_v26  ;;  %v1648_v0 = vmul.f32 %v2020_v60, %v1600_v51  ;;  %v1058_v43 = vpop.xlane.xlu0 %1057  ;;  %v1603_v51 = vsub.f32 %v2646_v59, %v2973_v4 }
 0x30a   :  { %v1507_v42 = vadd.f32 1e-05, %v1459_v52  ;;  %v1460_v34 = vmax.f32 %v1412_v5, 0.0  ;;  %v2994_v40 = vmul.f32 0.0078125, %v1058_v43  ;;  %v1365_v19 = vmul.f32 %v2989_v61, %v2989_v61 }
 0x30b   :  { %v1757_v55 = vadd.f32 %v2777_v8, %v1702_v24  ;;  %v1703_v50 = vmul.f32 %v2769_v15, %v1648_v0  ;;  %v1249_v32 = vpop.xlane.xlu1 %1248  ;;  %v1604_v24 = vsub.f32 %v2649_v3, %v2978_v54 }
 0x30c   :  { %2025 = vrsqrt.f32 %v1507_v42  ;;  %v1508_v21 = vadd.f32 1e-05, %v1460_v34  ;;  %v1317_v10 = vmul.f32 0.0078125, %v1249_v32  ;;  %v1366_v46 = vmul.f32 %v2994_v40, %v2994_v40 }
 0x30d   :  { %1805 = vst [vmem:[#allocation8 + $0xa8] sm:$0xff] %v1757_v55  ;;  %v1758_v47 = vadd.f32 %v2777_v8, %v1703_v50  ;;  %v1251_v30 = vpop.xlane.xlu0 %1250 }
 0x30e   :  { %v2022_v29 = vpop.eup %2021  ;;  %2027 = vrsqrt.f32 %v1508_v21  ;;  %v1413_v9 = vsub.f32 %v1317_v10, %v1365_v19  ;;  %v1318_v48 = vmul.f32 0.0078125, %v1251_v30 }
 0x30f   :  { %1806 = vst [vmem:[#allocation8 + $0xb0] sm:$0xff] %v1758_v47  ;;  %v1649_v35 = vmul.f32 %v2022_v29, %v1601_v6  ;;  %v1060_v20 = vpop.xlane.xlu1 %1059 }
 0x310   :  { %v2024_v38 = vpop.eup %2023  ;;  %v1461_v33 = vmax.f32 %v1413_v9, 0.0  ;;  %v1414_v14 = vsub.f32 %v1318_v48, %v1366_v46  ;;  %v3005_v13 = vmul.f32 0.0078125, %v1060_v20  ;;  %v1605_v9 = vsub.f32 %v2658_v16, %v2989_v61 }
 0x311   :  { %v1704_v44 = vmul.f32 %v2769_v15, %v1649_v35  ;;  %v1650_v56 = vmul.f32 %v2024_v38, %v1602_v53  ;;  %v1062_v12 = vpop.xlane.xlu0 %1061 }
 0x312   :  { %v1509_v23 = vadd.f32 1e-05, %v1461_v33  ;;  %v1462_v31 = vmax.f32 %v1414_v14, 0.0  ;;  %v3010_v57 = vmul.f32 0.0078125, %v1062_v12  ;;  %v1367_v11 = vmul.f32 %v3005_v13, %v3005_v13 }
 0x313   :  { %v1759_v28 = vadd.f32 %v2777_v8, %v1704_v44  ;;  %v1705_v62 = vmul.f32 %v2769_v15, %v1650_v56  ;;  %v1253_v49 = vpop.xlane.xlu1 %1252  ;;  %v1606_v33 = vsub.f32 %v2661_v22, %v2994_v40 }
 0x314   :  { %2029 = vrsqrt.f32 %v1509_v23  ;;  %v1510_v63 = vadd.f32 1e-05, %v1462_v31  ;;  %v1319_v17 = vmul.f32 0.0078125, %v1253_v49  ;;  %v1368_v60 = vmul.f32 %v3010_v57, %v3010_v57 }
 0x315   :  { %1807 = vst [vmem:[#allocation8 + $0xb8] sm:$0xff] %v1759_v28  ;;  %v1760_v36 = vadd.f32 %v2777_v8, %v1705_v62  ;;  %v1255_v26 = vpop.xlane.xlu0 %1254 }
 0x316   :  { %v2026_v7 = vpop.eup %2025  ;;  %2031 = vrsqrt.f32 %v1510_v63  ;;  %v1415_v52 = vsub.f32 %v1319_v17, %v1367_v11  ;;  %v1320_v5 = vmul.f32 0.0078125, %v1255_v26 }
 0x317   :  { %1808 = vst [vmem:[#allocation8 + $0xc0] sm:$0xff] %v1760_v36  ;;  %v1651_v0 = vmul.f32 %v2026_v7, %v1603_v51  ;;  %v1064_v43 = vpop.xlane.xlu1 %1063  ;;  %v1607_v7 = vsub.f32 %v2670_v37, %v3005_v13 }
 0x318   :  { %v2028_v42 = vpop.eup %2027  ;;  %v1463_v34 = vmax.f32 %v1415_v52, 0.0  ;;  %v1416_v55 = vsub.f32 %v1320_v5, %v1368_v60  ;;  %v3021_v50 = vmul.f32 0.0078125, %v1064_v43  ;;  %v1608_v43 = vsub.f32 %v2673_v45, %v3010_v57 }
 0x319   :  { %v1706_v59 = vmul.f32 %v2769_v15, %v1651_v0  ;;  %v1652_v4 = vmul.f32 %v2028_v42, %v1604_v24  ;;  %v1066_v32 = vpop.xlane.xlu0 %1065 }
 0x31a   :  { %v1511_v21 = vadd.f32 1e-05, %v1463_v34  ;;  %v1464_v19 = vmax.f32 %v1416_v55, 0.0  ;;  %v3026_v6 = vmul.f32 0.0078125, %v1066_v32  ;;  %v1369_v30 = vmul.f32 %v3021_v50, %v3021_v50 }
 0x31b   :  { %v1761_v10 = vadd.f32 %v2777_v8, %v1706_v59  ;;  %v1707_v47 = vmul.f32 %v2769_v15, %v1652_v4  ;;  %v1257_v3 = vpop.xlane.xlu1 %1256 }
 0x31c   :  { %2033 = vrsqrt.f32 %v1511_v21  ;;  %v1512_v54 = vadd.f32 1e-05, %v1464_v19  ;;  %v1321_v29 = vmul.f32 0.0078125, %v1257_v3  ;;  %v1370_v35 = vmul.f32 %v3026_v6, %v3026_v6 }
 0x31d   :  { %1809 = vst [vmem:[#allocation8 + $0xc8] sm:$0xff] %v1761_v10  ;;  %v1762_v46 = vadd.f32 %v2777_v8, %v1707_v47  ;;  %v1259_v48 = vpop.xlane.xlu0 %1258 }
 0x31e   :  { %v2030_v53 = vpop.eup %2029  ;;  %2035 = vrsqrt.f32 %v1512_v54  ;;  %v1417_v20 = vsub.f32 %v1321_v29, %v1369_v30  ;;  %v1322_v38 = vmul.f32 0.0078125, %v1259_v48 }
 0x31f   :  { %1810 = vst [vmem:[#allocation8 + $0xd0] sm:$0xff] %v1762_v46  ;;  %v1653_v14 = vmul.f32 %v2030_v53, %v1605_v9  ;;  %v1068_v44 = vpop.xlane.xlu1 %1067  ;;  %v1609_v9 = vsub.f32 %v2682_v1, %v3021_v50  ;;  %v3074_v1 = vld [vmem:[%s3197_s5] ss:$0 sm:$0xff]  ;;  %s2224_s5 = smov [#allocation8]  }
 0x320   :  { %v2032_v56 = vpop.eup %2031  ;;  %v1465_v12 = vmax.f32 %v1417_v20, 0.0  ;;  %v1418_v23 = vsub.f32 %v1322_v38, %v1370_v35  ;;  %v3037_v31 = vmul.f32 0.0078125, %v1068_v44  ;;  %v1610_v38 = vsub.f32 %v2685_v2, %v3026_v6  ;;  %v3080_v2 = vld [vmem:[%s3198_s6] ss:$0 sm:$0xff]  ;;  %s1837_s6 = sshll.u32 %s2224_s5, 4  ;;  %s1838_s6 = int_to_ptr.vmem [resolvable:$true] %s1837_s6 }
 0x321   :  { %v1708_v16 = vmul.f32 %v2769_v15, %v1653_v14  ;;  %v1654_v61 = vmul.f32 %v2032_v56, %v1606_v33  ;;  %v1070_v28 = vpop.xlane.xlu0 %1069  ;;  %s2187_s26 = scalar_lea.vmem %s1838_s6, 6144  ;;  %p2192_p11 = scmp.lt.s32.totalorder %s1838_s6, %s1838_s6 }
 0x322   :  { %v1513_v62 = vadd.f32 1e-05, %v1465_v12  ;;  %v1466_v49 = vmax.f32 %v1418_v23, 0.0  ;;  %v3042_v17 = vmul.f32 0.0078125, %v1070_v28  ;;  %v1371_v36 = vmul.f32 %v3037_v31, %v3037_v31  ;;  %p2188_p10 = scmp.ne.s32.totalorder %s1838_s6, %s2187_s26  ;;  %p2193_p12 = scmp.lt.s32.totalorder %s2187_s26, %s2187_s26 }
 0x323   :  { %v1763_v63 = vadd.f32 %v2777_v8, %v1708_v16  ;;  %v1709_v11 = vmul.f32 %v2769_v15, %v1654_v61  ;;  %v1261_v22 = vpop.xlane.xlu1 %1260 }
 0x324   :  { %2037 = vrsqrt.f32 %v1513_v62  ;;  %v1514_v40 = vadd.f32 1e-05, %v1466_v49  ;;  %v1323_v51 = vmul.f32 0.0078125, %v1261_v22  ;;  %v1372_v5 = vmul.f32 %v3042_v17, %v3042_v17  ;;  %p2194_p13 = por %p2193_p12, %p2192_p11 }
 0x325   :  { %1811 = vst [vmem:[#allocation8 + $0xd8] sm:$0xff] %v1763_v63  ;;  %v1764_v26 = vadd.f32 %v2777_v8, %v1709_v11  ;;  %v1263_v60 = vpop.xlane.xlu0 %1262 }
 0x326   :  { %v2034_v52 = vpop.eup %2033  ;;  %2039 = vrsqrt.f32 %v1514_v40  ;;  %v1419_v24 = vsub.f32 %v1323_v51, %v1371_v36  ;;  %v1324_v0 = vmul.f32 0.0078125, %v1263_v60  ;;  %v1611_v51 = vsub.f32 %v2694_v18, %v3037_v31  ;;  %p2195_p0 = pnand %p2194_p13, %p2188_p10 }
 0x327   :  { %1812 = vst [vmem:[#allocation8 + $0xe0] sm:$0xff] %v1764_v26  ;;  %v1655_v42 = vmul.f32 %v2034_v52, %v1607_v7  ;;  %v1072_v34 = vpop.xlane.xlu1 %1071 }
 0x328   :  { %v2036_v55 = vpop.eup %2035  ;;  %v1467_v59 = vmax.f32 %v1419_v24, 0.0  ;;  %v1420_v4 = vsub.f32 %v1324_v0, %v1372_v5  ;;  %v3053_v32 = vmul.f32 0.0078125, %v1072_v34  ;;  %v1612_v24 = vsub.f32 %v2697_v25, %v3042_v17 }
 0x329   :  { %v1710_v37 = vmul.f32 %v2769_v15, %v1655_v42  ;;  %v1656_v13 = vmul.f32 %v2036_v55, %v1608_v43  ;;  %v1074_v21 = vpop.xlane.xlu0 %1073 }
 0x32a   :  { %v1515_v19 = vadd.f32 1e-05, %v1467_v59  ;;  %v1468_v10 = vmax.f32 %v1420_v4, 0.0  ;;  %v3058_v54 = vmul.f32 0.0078125, %v1074_v21  ;;  %v1373_v30 = vmul.f32 %v3053_v32, %v3053_v32 }
 0x32b   :  { %v1765_v47 = vadd.f32 %v2777_v8, %v1710_v37  ;;  %v1711_v3 = vmul.f32 %v2769_v15, %v1656_v13  ;;  %v1265_v45 = vpop.xlane.xlu1 %1264 }
 0x32c   :  { %2041 = vrsqrt.f32 %v1515_v19  ;;  %v1516_v57 = vadd.f32 1e-05, %v1468_v10  ;;  %v1325_v29 = vmul.f32 0.0078125, %v1265_v45  ;;  %v1374_v15 = vmul.f32 %v3058_v54, %v3058_v54 }
 0x32d   :  { %1813 = vst [vmem:[#allocation8 + $0xe8] sm:$0xff] %v1765_v47  ;;  %v1766_v46 = vadd.f32 %v2777_v8, %v1711_v3  ;;  %v1267_v48 = vpop.xlane.xlu0 %1266 }
 0x32e   :  { %v2038_v53 = vpop.eup %2037  ;;  %2043 = vrsqrt.f32 %v1516_v57  ;;  %v1421_v35 = vsub.f32 %v1325_v29, %v1373_v30  ;;  %v1326_v20 = vmul.f32 0.0078125, %v1267_v48  ;;  %v1613_v57 = vsub.f32 %v2706_v41, %v3053_v32 }
 0x32f   :  { %1814 = vst [vmem:[#allocation8 + $0xf0] sm:$0xff] %v1766_v46  ;;  %v1657_v33 = vmul.f32 %v2038_v53, %v1609_v9  ;;  %v1076_v14 = vpop.xlane.xlu1 %1075  ;;  %v3218_v53 = vld [vmem:[#allocation12_spill] sm:$0xff] }
 0x330   :  { %v2040_v44 = vpop.eup %2039  ;;  %v1469_v56 = vmax.f32 %v1421_v35, 0.0  ;;  %v1422_v8 = vsub.f32 %v1326_v20, %v1374_v15  ;;  %v3069_v12 = vmul.f32 0.0078125, %v1076_v14  ;;  %v1614_v15 = vsub.f32 %v3218_v53, %v3058_v54 }
 0x331   :  { %v1712_v50 = vmul.f32 %v3074_v1, %v1657_v33  ;;  %v1658_v23 = vmul.f32 %v2040_v44, %v1610_v38  ;;  %v1078_v16 = vpop.xlane.xlu0 %1077 }
 0x332   :  { %v1517_v61 = vadd.f32 1e-05, %v1469_v56  ;;  %v1470_v28 = vmax.f32 %v1422_v8, 0.0  ;;  %v3084_v49 = vmul.f32 0.0078125, %v1078_v16  ;;  %v1375_v22 = vmul.f32 %v3069_v12, %v3069_v12 }
 0x333   :  { %v1767_v6 = vadd.f32 %v3080_v2, %v1712_v50  ;;  %v1713_v62 = vmul.f32 %v3074_v1, %v1658_v23  ;;  %v1269_v63 = vpop.xlane.xlu1 %1268 }
 0x334   :  { %2045 = vrsqrt.f32 %v1517_v61  ;;  %v1518_v11 = vadd.f32 1e-05, %v1470_v28  ;;  %v1327_v40 = vmul.f32 0.0078125, %v1269_v63  ;;  %v1376_v60 = vmul.f32 %v3084_v49, %v3084_v49 }
 0x335   :  { %1815 = vst [vmem:[#allocation8 + $0xf8] sm:$0xff] %v1767_v6  ;;  %v1768_v36 = vadd.f32 %v3080_v2, %v1713_v62  ;;  %v1271_v26 = vpop.xlane.xlu0 %1270 }
 0x336   :  { %v2042_v7 = vpop.eup %2041  ;;  %2047 = vrsqrt.f32 %v1518_v11  ;;  %v1423_v52 = vsub.f32 %v1327_v40, %v1375_v22  ;;  %v1328_v5 = vmul.f32 0.0078125, %v1271_v26  ;;  %v3219_v11 = vld [vmem:[#allocation13_spill] sm:$0xff] }
 0x337   :  { %1816 = vst [vmem:[#allocation8 + $0x100] sm:$0xff] %v1768_v36  ;;  %v1659_v0 = vmul.f32 %v2042_v7, %v1611_v51  ;;  %v1080_v43 = vpop.xlane.xlu1 %1079  ;;  %v1615_v22 = vsub.f32 %v3219_v11, %v3069_v12 }
 0x338   :  { %v2044_v42 = vpop.eup %2043  ;;  %v1471_v34 = vmax.f32 %v1423_v52, 0.0  ;;  %v1424_v55 = vsub.f32 %v1328_v5, %v1376_v60  ;;  %v3095_v59 = vmul.f32 0.0078125, %v1080_v43  ;;  %v3220_v60 = vld [vmem:[#allocation14_spill] sm:$0xff] }
 0x339   :  { %v1714_v18 = vmul.f32 %v3074_v1, %v1659_v0  ;;  %v1660_v31 = vmul.f32 %v2044_v42, %v1612_v24  ;;  %v1082_v4 = vpop.xlane.xlu0 %1081  ;;  %v1616_v52 = vsub.f32 %v3220_v60, %v3084_v49 }
 0x33a   :  { %v1519_v37 = vadd.f32 1e-05, %v1471_v34  ;;  %v1472_v13 = vmax.f32 %v1424_v55, 0.0  ;;  %v3100_v10 = vmul.f32 0.0078125, %v1082_v4  ;;  %v1377_v47 = vmul.f32 %v3095_v59, %v3095_v59 }
 0x33b   :  { %v1769_v21 = vadd.f32 %v3080_v2, %v1714_v18  ;;  %v1715_v19 = vmul.f32 %v3074_v1, %v1660_v31  ;;  %v1273_v25 = vpop.xlane.xlu1 %1272 }
 0x33c   :  { %2049 = vrsqrt.f32 %v1519_v37  ;;  %v1520_v17 = vadd.f32 1e-05, %v1472_v13  ;;  %v1329_v3 = vmul.f32 0.0078125, %v1273_v25  ;;  %v1378_v46 = vmul.f32 %v3100_v10, %v3100_v10 }
 0x33d   :  { %1817 = vst [vmem:[#allocation8 + $0x108] sm:$0xff] %v1769_v21  ;;  %v1770_v45 = vadd.f32 %v3080_v2, %v1715_v19  ;;  %v1275_v30 = vpop.xlane.xlu0 %1274 }
 0x33e   :  { %v2046_v29 = vpop.eup %2045  ;;  %2051 = vrsqrt.f32 %v1520_v17  ;;  %v1425_v9 = vsub.f32 %v1329_v3, %v1377_v47  ;;  %v1330_v48 = vmul.f32 0.0078125, %v1275_v30  ;;  %v3221_v3 = vld [vmem:[#allocation15_spill] sm:$0xff] }
 0x33f   :  { %1818 = vst [vmem:[#allocation8 + $0x110] sm:$0xff] %v1770_v45  ;;  %v1661_v35 = vmul.f32 %v2046_v29, %v1613_v57  ;;  %v1084_v20 = vpop.xlane.xlu1 %1083  ;;  %v1617_v45 = vsub.f32 %v3221_v3, %v3095_v59 }
 0x340   :  { %v2048_v38 = vpop.eup %2047  ;;  %v1473_v33 = vmax.f32 %v1425_v9, 0.0  ;;  %v1426_v14 = vsub.f32 %v1330_v48, %v1378_v46  ;;  %v3111_v44 = vmul.f32 0.0078125, %v1084_v20  ;;  %v3222_v48 = vld [vmem:[#allocation16_spill] sm:$0xff] }
 0x341   :  { %v1716_v41 = vmul.f32 %v3074_v1, %v1661_v35  ;;  %v1662_v32 = vmul.f32 %v2048_v38, %v1614_v15  ;;  %v1086_v56 = vpop.xlane.xlu0 %1085  ;;  %v1618_v53 = vsub.f32 %v3222_v48, %v3100_v10 }
 0x342   :  { %v1521_v8 = vadd.f32 1e-05, %v1473_v33  ;;  %v1474_v50 = vmax.f32 %v1426_v14, 0.0  ;;  %v3116_v61 = vmul.f32 0.0078125, %v1086_v56  ;;  %v1379_v6 = vmul.f32 %v3111_v44, %v3111_v44 }
 0x343   :  { %v1771_v23 = vadd.f32 %v3080_v2, %v1716_v41  ;;  %v1717_v16 = vmul.f32 %v3074_v1, %v1662_v32  ;;  %v1277_v54 = vpop.xlane.xlu1 %1276 }
 0x344   :  { %2053 = vrsqrt.f32 %v1521_v8  ;;  %v1522_v28 = vadd.f32 1e-05, %v1474_v50  ;;  %v1331_v62 = vmul.f32 0.0078125, %v1277_v54  ;;  %v1380_v51 = vmul.f32 %v3116_v61, %v3116_v61 }
 0x345   :  { %1819 = vst [vmem:[#allocation8 + $0x118] sm:$0xff] %v1771_v23  ;;  %v1772_v63 = vadd.f32 %v3080_v2, %v1717_v16  ;;  %v1279_v40 = vpop.xlane.xlu0 %1278 }
 0x346   :  { %v2050_v36 = vpop.eup %2049  ;;  %2055 = vrsqrt.f32 %v1522_v28  ;;  %v1427_v26 = vsub.f32 %v1331_v62, %v1379_v6  ;;  %v1332_v7 = vmul.f32 0.0078125, %v1279_v40 }
 0x347   :  { %1820 = vst [vmem:[#allocation8 + $0x120] sm:$0xff] %v1772_v63  ;;  %v1663_v5 = vmul.f32 %v2050_v36, %v1615_v22  ;;  %v1088_v24 = vpop.xlane.xlu1 %1087  ;;  %v3223_v63 = vld [vmem:[#allocation17_spill] sm:$0xff] }
 0x348   :  { %v2052_v0 = vpop.eup %2051  ;;  %v1475_v43 = vmax.f32 %v1427_v26, 0.0  ;;  %v1428_v42 = vsub.f32 %v1332_v7, %v1380_v51  ;;  %v3127_v34 = vmul.f32 0.0078125, %v1088_v24  ;;  %v1619_v11 = vsub.f32 %v3223_v63, %v3111_v44  ;;  %v3224_v7 = vld [vmem:[#allocation18_spill] sm:$0xff] }
 0x349   :  { %v1718_v12 = vmul.f32 %v3074_v1, %v1663_v5  ;;  %v1664_v55 = vmul.f32 %v2052_v0, %v1616_v52  ;;  %v1090_v18 = vpop.xlane.xlu0 %1089  ;;  %v1620_v60 = vsub.f32 %v3224_v7, %v3116_v61 }
 0x34a   :  { %v1523_v31 = vadd.f32 1e-05, %v1475_v43  ;;  %v1476_v4 = vmax.f32 %v1428_v42, 0.0  ;;  %v3132_v21 = vmul.f32 0.0078125, %v1090_v18  ;;  %v1381_v25 = vmul.f32 %v3127_v34, %v3127_v34 }
 0x34b   :  { %v1773_v37 = vadd.f32 %v3080_v2, %v1718_v12  ;;  %v1719_v13 = vmul.f32 %v3074_v1, %v1664_v55  ;;  %v1281_v49 = vpop.xlane.xlu1 %1280 }
 0x34c   :  { %2057 = vrsqrt.f32 %v1523_v31  ;;  %v1524_v19 = vadd.f32 1e-05, %v1476_v4  ;;  %v1333_v17 = vmul.f32 0.0078125, %v1281_v49  ;;  %v1382_v29 = vmul.f32 %v3132_v21, %v3132_v21 }
 0x34d   :  { %1821 = vst [vmem:[#allocation8 + $0x128] sm:$0xff] %v1773_v37  ;;  %v1774_v47 = vadd.f32 %v3080_v2, %v1719_v13  ;;  %v1283_v57 = vpop.xlane.xlu0 %1282 }
 0x34e   :  { %v2054_v30 = vpop.eup %2053  ;;  %2059 = vrsqrt.f32 %v1524_v19  ;;  %v1429_v46 = vsub.f32 %v1333_v17, %v1381_v25  ;;  %v1334_v9 = vmul.f32 0.0078125, %v1283_v57  ;;  %v3225_v25 = vld [vmem:[#allocation19_spill] sm:$0xff] }
 0x34f   :  { %1822 = vst [vmem:[#allocation8 + $0x130] sm:$0xff] %v1774_v47  ;;  %v1665_v15 = vmul.f32 %v2054_v30, %v1617_v45  ;;  %v1092_v35 = vpop.xlane.xlu1 %1091  ;;  %v1621_v17 = vsub.f32 %v3225_v25, %v3127_v34  ;;  %v3226_v45 = vld [vmem:[#allocation20_spill] sm:$0xff] }
 0x350   :  { %v2056_v20 = vpop.eup %2055  ;;  %v1477_v38 = vmax.f32 %v1429_v46, 0.0  ;;  %v1430_v33 = vsub.f32 %v1334_v9, %v1382_v29  ;;  %v3143_v14 = vmul.f32 0.0078125, %v1092_v35  ;;  %v1622_v57 = vsub.f32 %v3226_v45, %v3132_v21 }
 0x351   :  { %v1720_v59 = vmul.f32 %v3074_v1, %v1665_v15  ;;  %v1666_v41 = vmul.f32 %v2056_v20, %v1618_v53  ;;  %v1094_v32 = vpop.xlane.xlu0 %1093 }
 0x352   :  { %v1525_v56 = vadd.f32 1e-05, %v1477_v38  ;;  %v1478_v8 = vmax.f32 %v1430_v33, 0.0  ;;  %v1144_v16 = vmul.f32 0.0078125, %v1094_v32  ;;  %v1383_v28 = vmul.f32 %v3143_v14, %v3143_v14 }
 0x353   :  { %v1775_v50 = vadd.f32 %v3080_v2, %v1720_v59  ;;  %v1721_v23 = vmul.f32 %v3074_v1, %v1666_v41  ;;  %v1285_v54 = vpop.xlane.xlu1 %1284  ;;  %v1623_v20 = vsub.f32 %v2826_v27, %v3143_v14 }
 0x354   :  { %2061 = vrsqrt.f32 %v1525_v56  ;;  %v1526_v10 = vadd.f32 1e-05, %v1478_v8  ;;  %v1335_v6 = vmul.f32 0.0078125, %v1285_v54  ;;  %v1384_v36 = vmul.f32 %v1144_v16, %v1144_v16 }
 0x355   :  { %1823 = vst [vmem:[#allocation8 + $0x138] sm:$0xff] %v1775_v50  ;;  %v1776_v62 = vadd.f32 %v3080_v2, %v1721_v23  ;;  %v1287_v22 = vpop.xlane.xlu0 %1286  ;;  %v1624_v21 = vsub.f32 %v2834_v58, %v1144_v16 }
 0x356   :  { %v2058_v40 = vpop.eup %2057  ;;  %2063 = vrsqrt.f32 %v1526_v10  ;;  %v1431_v51 = vsub.f32 %v1335_v6, %v1383_v28  ;;  %v1336_v26 = vmul.f32 0.0078125, %v1287_v22 }
 0x357   :  { %1824 = vst [vmem:[#allocation8 + $0x140] sm:$0xff] %v1776_v62  ;;  %v1667_v52 = vmul.f32 %v2058_v40, %v1619_v11  ;;  %v1096_v5 = vpop.xlane.xlu1 %1095 }
 0x358   :  { %v2060_v24 = vpop.eup %2059  ;;  %v1479_v0 = vmax.f32 %v1431_v51, 0.0  ;;  %v1432_v43 = vsub.f32 %v1336_v26, %v1384_v36  ;;  %v1145_v42 = vmul.f32 0.0078125, %v1096_v5 }
 0x359   :  { %v1722_v12 = vmul.f32 %v3074_v1, %v1667_v52  ;;  %v1668_v55 = vmul.f32 %v2060_v24, %v1620_v60 }
 0x35a   :  { %v1527_v44 = vadd.f32 1e-05, %v1479_v0  ;;  %v1480_v18 = vmax.f32 %v1432_v43, 0.0  ;;  %v1385_v49 = vmul.f32 %v1145_v42, %v1145_v42  ;;  %v1625_v23 = vsub.f32 %v2856_v39, %v1145_v42 }
 0x35b   :  { %v1777_v31 = vadd.f32 %v3080_v2, %v1722_v12  ;;  %v1723_v4 = vmul.f32 %v3074_v1, %v1668_v55  ;;  %v1289_v37 = vpop.xlane.xlu1 %1288 }
 0x35c   :  { %2065 = vrsqrt.f32 %v1527_v44  ;;  %v1528_v13 = vadd.f32 1e-05, %v1480_v18  ;;  %v1337_v61 = vmul.f32 0.0078125, %v1289_v37 }
 0x35d   :  { %1825 = vst [vmem:[#allocation8 + $0x148] sm:$0xff] %v1777_v31  ;;  %v1778_v19 = vadd.f32 %v3080_v2, %v1723_v4 }
 0x35e   :  { %v2062_v47 = vpop.eup %2061  ;;  %2067 = vrsqrt.f32 %v1528_v13  ;;  %v1433_v3 = vsub.f32 %v1337_v61, %v1385_v49 }
 0x35f   :  { %1826 = vst [vmem:[#allocation8 + $0x150] sm:$0xff] %v1778_v19  ;;  %v1669_v30 = vmul.f32 %v2062_v47, %v1621_v17 }
 0x360   :  { %v2064_v29 = vpop.eup %2063  ;;  %v1481_v46 = vmax.f32 %v1433_v3, 0.0 }
 0x361   :  { %v1724_v9 = vmul.f32 %v3074_v1, %v1669_v30  ;;  %v1670_v48 = vmul.f32 %v2064_v29, %v1622_v57 }
 0x362   :  { %v1529_v53 = vadd.f32 1e-05, %v1481_v46 }
 0x363   :  { %v1779_v15 = vadd.f32 %v3080_v2, %v1724_v9  ;;  %v1725_v35 = vmul.f32 %v3074_v1, %v1670_v48 }
 0x364   :  { %2069 = vrsqrt.f32 %v1529_v53 }
 0x365   :  { %1827 = vst [vmem:[#allocation8 + $0x158] sm:$0xff] %v1779_v15  ;;  %v1780_v34 = vadd.f32 %v3080_v2, %v1725_v35 }
 0x366   :  { %v2066_v38 = vpop.eup %2065 }
 0x367   :  { %1828 = vst [vmem:[#allocation8 + $0x160] sm:$0xff] %v1780_v34  ;;  %v1671_v33 = vmul.f32 %v2066_v38, %v1623_v20 }
 0x368   :  { %v2068_v59 = vpop.eup %2067 }
 0x369   :  { %v1726_v41 = vmul.f32 %v3074_v1, %v1671_v33  ;;  %v1672_v32 = vmul.f32 %v2068_v59, %v1624_v21 }
 0x36b   :  { %v1781_v56 = vadd.f32 %v3080_v2, %v1726_v41  ;;  %v1727_v8 = vmul.f32 %v3074_v1, %v1672_v32 }
 0x36d   :  { %1829 = vst [vmem:[#allocation8 + $0x168] sm:$0xff] %v1781_v56  ;;  %v1782_v50 = vadd.f32 %v3080_v2, %v1727_v8 }
 0x36e   :  { %v2070_v54 = vpop.eup %2069 }
 0x36f   :  { %1830 = vst [vmem:[#allocation8 + $0x170] sm:$0xff] %v1782_v50  ;;  %v1673_v27 = vmul.f32 %v2070_v54, %v1625_v23 }
 0x371   :  { %v1728_v58 = vmul.f32 %v3074_v1, %v1673_v27 }
 0x373   :  { %v1783_v14 = vadd.f32 %v3080_v2, %v1728_v58 }
 0x375   :  { %1831 = vst [vmem:[#allocation8 + $0x178] sm:$0xff] %v1783_v14 }
 0x376   :  { %2198 = shalt.err (!%p2195_p0)
}
 0x377   :  { %s2199_s29 = scalar_lea.hbm %s3199_s7, 6144 }
 0x378   :  { %p2200_p1 = scmp.ne.s32.totalorder %s3199_s7, %s2199_s29  ;;  %p2203_p2 = scmp.lt.u32.totalorder %s2199_s29, %s3199_s7 }
 0x37a   :  { %p2205_p3 = pnand %p2203_p2, %p2200_p1 }
 0x37c   :  { %2208 = shalt.err (!%p2205_p3)
}
 0x37d   :  { %1843 = dma.vmem_to_hbm [thread:$0]  %s1838_s6, 6144, %s3199_s7, [#allocation4], %s2219_s1, %s2219_s1, %s2220_s25  }
 0x37e   :  { %2213 = dma.done.wait [#allocation4], 6144  }
 0x37f   :  { %2214 = vsyncadd [#allocation4], 4294961152 }
 0x380   :  { %1847 = vsyncpa [#allocation3], 1 }
 0x381   :  { %1848 = vsyncpa [#allocation6], 1 }
 0x382   :  { %1849 = vsyncpa [#allocation4], 1 }

</bundles_post_ra>
